<compile_context>
chip_gen: v7x
topology: tpu7x:2x2x1
jax: 0.10.0
libtpu: 0.0.40
codegen_flags: <defaults>
</compile_context>

<pallas_src>
import jax
import jax.numpy as jnp
from jax import lax
from jax.experimental import pallas as pl
from jax.experimental.pallas import tpu as pltpu

# Accurate f32 matmuls everywhere (wrapper hyper-nets + reference) so the
# post-LN comparison is not polluted by default bf16-pass MXU error.
jax.config.update("jax_default_matmul_precision", "highest")

# ----------------------- "config" (synthetic, small) -------------------------
BATCH, SEQ = 2, 8
INPUT_DIM = 32          # config.input_dim
ADAPTER_DIM = 16        # config.adapter_dim
TASK_EMB_DIM = 16       # task embedding dim fed to the hyper-networks
ACTIVATION = "swish"    # config.adapter_non_linearity
ADD_LN_BEFORE = True    # config.add_layer_norm_before_adapter
ADD_LN_AFTER = True     # config.add_layer_norm_after_adapter
CONDITIONAL_LN = True   # config.conditional_layer_norm
LN_EPS = 1e-5

# Lane-dense packing: 4 tokens of 32 features per 128-lane vreg row.
PACK = 4
D_PACKED = PACK * INPUT_DIM      # 128
AD_PACKED = PACK * ADAPTER_DIM   # 64

# Packed rows per grid step (1024 rows = 4096 tokens = 512 KiB f32 per buffer).
MAX_TILE_ROWS = 1024
# Below this many packed rows a single full-array block is cheapest.
MIN_SPLIT_ROWS = 16

# Row layout of the packed per-call constants array (shape (8, D_PACKED)).
_ROW_B_DOWN, _ROW_B_UP, _ROW_PRE_G, _ROW_PRE_B, _ROW_POST_G, _ROW_POST_B = range(6)
CONST_ROWS = 8          # padded to a full sublane tile


def _cdiv(a, b):
    return -(-a // b)


def _round_up(x, m):
    return _cdiv(x, m) * m


def _choose_tile_rows(num_rows):
    """Pick (tile_rows, grid) for the packed (num_rows, 128) token stream."""
    if num_rows < MIN_SPLIT_ROWS:
        # Tiny problem: one full-array block (block == full dims is always legal).
        return num_rows, 1
    # >=2 programs so both v7x TensorCores get work; cap tile size; round the
    # tile to a sublane multiple so the (8,128) constraint holds; the last block
    # may run past the array end -> Pallas masks the OOB tail.
    num_programs = max(2, _cdiv(num_rows, MAX_TILE_ROWS))
    tile_rows = _round_up(_cdiv(num_rows, num_programs), 8)
    return tile_rows, _cdiv(num_rows, tile_rows)


# ------------------------------- Pallas kernel -------------------------------
def meta_adapter_kernel(x_ref, avg_ref, wdn_ref, wup_ref, c_ref, o_ref):
    # x: (TM, 128) -- 4 tokens per row, lanes [g*32:(g+1)*32] = token g.
    x = x_ref[...].astype(jnp.float32)
    avg = avg_ref[...]                       # (128,128) block-diag 1/INPUT_DIM

    def cond_ln(v, g_row, b_row):
        # Per-token (= per 32-lane segment) statistics via MXU segment-mean
        # matmuls; stable two-pass variance; stats kept in f32.
        mu = jnp.dot(v, avg, preferred_element_type=jnp.float32,
                     precision=lax.Precision.HIGHEST)
        xc = v - mu
        var = jnp.dot(xc * xc, avg, preferred_element_type=jnp.float32,
                      precision=lax.Precision.HIGHEST)
        vhat = xc * lax.rsqrt(var + LN_EPS)
        return vhat * c_ref[g_row:g_row + 1, :] + c_ref[b_row:b_row + 1, :]

    # ---- pre layer norm (conditional gamma/beta generated from task emb) ----
    z = cond_ln(x, _ROW_PRE_G, _ROW_PRE_B) if ADD_LN_BEFORE else x

    # ---- down projection: block-diagonal z @ W_down^T + b_down -> (TM, 64) --
    down = jnp.dot(z, wdn_ref[...], preferred_element_type=jnp.float32,
                   precision=lax.Precision.HIGHEST)
    down = down + c_ref[_ROW_B_DOWN:_ROW_B_DOWN + 1, :AD_PACKED]

    # ---- non-linearity (exact sigmoid: exp on EUP, full-precision divide) ----
    if ACTIVATION == "swish":
        mid = down / (1.0 + jnp.exp(-down))
    elif ACTIVATION == "relu":
        mid = jnp.maximum(down, 0.0)
    else:  # gelu
        mid = jax.nn.gelu(down)

    # ---- up projection: block-diagonal mid @ W_up^T + b_up -> (TM, 128) -----
    up = jnp.dot(mid, wup_ref[...], preferred_element_type=jnp.float32,
                 precision=lax.Precision.HIGHEST)
    up = up + c_ref[_ROW_B_UP:_ROW_B_UP + 1, :]

    # ---- post layer norm ----
    y = cond_ln(up, _ROW_POST_G, _ROW_POST_B) if ADD_LN_AFTER else up

    # ---- residual; lane-dense (128-wide) unmasked store ----
    o_ref[...] = (y + x).astype(o_ref.dtype)


# ------------------------------- JAX wrapper ---------------------------------
def meta_adapter_forward(source_embedding, inputs, params):
    e = source_embedding.reshape(-1).astype(jnp.float32)      # (TASK_EMB_DIM,)

    # Hyper-network generation (tiny vector-matrix glue; stays in plain JAX).
    w_down = (e @ params["down_wg_w"] + params["down_wg_b"]).reshape(
        ADAPTER_DIM, INPUT_DIM)
    b_down = e @ params["down_bg_w"] + params["down_bg_b"]
    w_up = (e @ params["up_wg_w"] + params["up_wg_b"]).reshape(
        INPUT_DIM, ADAPTER_DIM)
    b_up = e @ params["up_bg_w"] + params["up_bg_b"]
    if CONDITIONAL_LN:
        pre_g = e @ params["pre_g_w"] + params["pre_g_b"]
        pre_b = e @ params["pre_b_w"] + params["pre_b_b"]
        post_g = e @ params["post_g_w"] + params["post_g_b"]
        post_b = e @ params["post_b_w"] + params["post_b_b"]
    else:
        pre_g, pre_b = params["pre_ln_g"], params["pre_ln_b"]
        post_g, post_b = params["post_ln_g"], params["post_ln_b"]

    # --- build lane-dense operands (tiny; done once per call) ---
    eye = jnp.eye(PACK, dtype=jnp.float32)
    wdn_bd = jnp.kron(eye, w_down.T.astype(jnp.float32))   # (128, 64) block-diag
    wup_bd = jnp.kron(eye, w_up.T.astype(jnp.float32))     # (64, 128) block-diag

    grp = jnp.arange(D_PACKED) // INPUT_DIM                 # segment ids (4 groups)
    avg = jnp.where(grp[:, None] == grp[None, :],
                    1.0 / INPUT_DIM, 0.0).astype(jnp.float32)  # (128,128)

    def tile_lanes(v):
        t = jnp.tile(v.astype(jnp.float32), PACK)
        return jnp.pad(t, (0, D_PACKED - t.shape[0]))

    consts = jnp.stack(
        [tile_lanes(b_down),          # (64 used) padded to 128
         tile_lanes(b_up),
         tile_lanes(pre_g), tile_lanes(pre_b),
         tile_lanes(post_g), tile_lanes(post_b),
         jnp.zeros((D_PACKED,), jnp.float32),
         jnp.zeros((D_PACKED,), jnp.float32)],
        axis=0)                                              # (8, 128)

    B, S, _ = inputs.shape
    N = B * S
    # Lane-dense repack: (N, 32) -> (N/4, 128). The reshape is a free,
    # contiguous relabelling; a copy is only forced when N % 4 != 0.
    n4 = _round_up(N, PACK)
    x2d = inputs.reshape(N, INPUT_DIM)
    if n4 != N:
        # TODO(synk): this <=3-token pad still copies the stream; a split
        # main/tail dispatch would avoid it for ragged N.
        x2d = jnp.pad(x2d, ((0, n4 - N), (0, 0)))
    num_rows = n4 // PACK
    x_packed = x2d.reshape(num_rows, D_PACKED)

    tile_rows, grid = _choose_tile_rows(num_rows)

    out_packed = pl.pallas_call(
        meta_adapter_kernel,
        out_shape=jax.ShapeDtypeStruct((num_rows, D_PACKED), inputs.dtype),
        grid_spec=pltpu.PrefetchScalarGridSpec(
            num_scalar_prefetch=0,
            grid=(grid,),
            in_specs=[
                pl.BlockSpec((tile_rows, D_PACKED), lambda i: (i, 0)),   # tokens
                pl.BlockSpec((D_PACKED, D_PACKED), lambda i: (0, 0)),    # LN avg matrix
                pl.BlockSpec((D_PACKED, AD_PACKED), lambda i: (0, 0)),   # W_down^T (bd)
                pl.BlockSpec((AD_PACKED, D_PACKED), lambda i: (0, 0)),   # W_up^T (bd)
                pl.BlockSpec((CONST_ROWS, D_PACKED), lambda i: (0, 0)),  # packed consts
            ],
            out_specs=pl.BlockSpec((tile_rows, D_PACKED), lambda i: (i, 0)),
        ),
        compiler_params=pltpu.CompilerParams(
            dimension_semantics=("parallel",),
            vmem_limit_bytes=8 * 1024 * 1024),
    )(x_packed, avg, wdn_bd, wup_bd, consts)

    out2d = out_packed.reshape(n4, INPUT_DIM)
    if n4 != N:
        out2d = out2d[:N]
    return out2d.reshape(B, S, INPUT_DIM)


# ------------------------- pure-JAX reference (check) ------------------------
def reference_forward(source_embedding, inputs, params):
    e = source_embedding.reshape(-1)
    w_down = (e @ params["down_wg_w"] + params["down_wg_b"]).reshape(ADAPTER_DIM, INPUT_DIM)
    b_down = e @ params["down_bg_w"] + params["down_bg_b"]
    w_up = (e @ params["up_wg_w"] + params["up_wg_b"]).reshape(INPUT_DIM, ADAPTER_DIM)
    b_up = e @ params["up_bg_w"] + params["up_bg_b"]
    if CONDITIONAL_LN:
        pre_g = e @ params["pre_g_w"] + params["pre_g_b"]
        pre_b = e @ params["pre_b_w"] + params["pre_b_b"]
        post_g = e @ params["post_g_w"] + params["post_g_b"]
        post_b = e @ params["post_b_w"] + params["post_b_b"]
    else:
        pre_g, pre_b = params["pre_ln_g"], params["pre_ln_b"]
        post_g, post_b = params["post_ln_g"], params["post_ln_b"]

    def ln(x, g, b):
        mu = jnp.mean(x, axis=-1, keepdims=True)
        var = jnp.mean(jnp.square(x - mu), axis=-1, keepdims=True)
        return (x - mu) * lax.rsqrt(var + LN_EPS) * g + b

    x = inputs
    z = ln(x, pre_g, pre_b) if ADD_LN_BEFORE else x
    down = z @ w_down.T + b_down
    if ACTIVATION == "swish":
        mid = down * jax.nn.sigmoid(down)
    elif ACTIVATION == "relu":
        mid = jax.nn.relu(down)
    else:
        mid = jax.nn.gelu(down)
    up = mid @ w_up.T + b_up
    y = ln(up, post_g, post_b) if ADD_LN_AFTER else up
    return y + x


# ----------------------------------- main ------------------------------------
def init_params(key):
    keys = jax.random.split(key, 12)
    s = 0.05
    return {
        # meta_down_sampler (DenseGenerator -> (ADAPTER_DIM, INPUT_DIM), (ADAPTER_DIM,))
        "down_wg_w": s * jax.random.normal(keys[0], (TASK_EMB_DIM, ADAPTER_DIM * INPUT_DIM), jnp.float32),
        "down_wg_b": s * jax.random.normal(keys[1], (ADAPTER_DIM * INPUT_DIM,), jnp.float32),
        "down_bg_w": s * jax.random.normal(keys[2], (TASK_EMB_DIM, ADAPTER_DIM), jnp.float32),
        "down_bg_b": s * jax.random.normal(keys[3], (ADAPTER_DIM,), jnp.float32),
        # meta_up_sampler (DenseGenerator -> (INPUT_DIM, ADAPTER_DIM), (INPUT_DIM,))
        "up_wg_w": s * jax.random.normal(keys[4], (TASK_EMB_DIM, INPUT_DIM * ADAPTER_DIM), jnp.float32),
        "up_wg_b": s * jax.random.normal(keys[5], (INPUT_DIM * ADAPTER_DIM,), jnp.float32),
        "up_bg_w": s * jax.random.normal(keys[6], (TASK_EMB_DIM, INPUT_DIM), jnp.float32),
        "up_bg_b": s * jax.random.normal(keys[7], (INPUT_DIM,), jnp.float32),
        # pre/post LayerNormGenerator (conditional path)
        "pre_g_w": s * jax.random.normal(keys[8], (TASK_EMB_DIM, INPUT_DIM), jnp.float32),
        "pre_g_b": jnp.ones((INPUT_DIM,), jnp.float32),
        "pre_b_w": s * jax.random.normal(keys[9], (TASK_EMB_DIM, INPUT_DIM), jnp.float32),
        "pre_b_b": jnp.zeros((INPUT_DIM,), jnp.float32),
        "post_g_w": s * jax.random.normal(keys[10], (TASK_EMB_DIM, INPUT_DIM), jnp.float32),
        "post_g_b": jnp.ones((INPUT_DIM,), jnp.float32),
        "post_b_w": s * jax.random.normal(keys[11], (TASK_EMB_DIM, INPUT_DIM), jnp.float32),
        "post_b_b": jnp.zeros((INPUT_DIM,), jnp.float32),
        # unconditional-LN params (so CONDITIONAL_LN=False cannot KeyError)
        "pre_ln_g": jnp.ones((INPUT_DIM,), jnp.float32),
        "pre_ln_b": jnp.zeros((INPUT_DIM,), jnp.float32),
        "post_ln_g": jnp.ones((INPUT_DIM,), jnp.float32),
        "post_ln_b": jnp.zeros((INPUT_DIM,), jnp.float32),
    }


if __name__ == "__main__":
    key = jax.random.PRNGKey(0)
    k1, k2, k3, k4, k_emb, k_par = jax.random.split(key, 6)

    source_embedding = jax.random.normal(k_emb, (TASK_EMB_DIM,), jnp.float32)
    params = init_params(k_par)
    fwd = jax.jit(meta_adapter_forward)

    TOL = 2e-3

    def check(k, shape, tag):
        x = jax.random.normal(k, shape, jnp.float32)
        out = jax.block_until_ready(fwd(source_embedding, x, params))
        ref = reference_forward(source_embedding, x, params)
        assert out.shape == x.shape and out.dtype == x.dtype, tag
        assert jnp.allclose(out, ref, atol=TOL, rtol=TOL), f"mismatch vs JAX reference ({tag})"

    # Case 1: the module's small shape (single full block).
    check(k1, (BATCH, SEQ, INPUT_DIM), "case 1")
    # Case 2: N not a multiple of 4 -> exercises the lane-packing tail pad.
    check(k2, (3, 7, INPUT_DIM), "case 2")
    # Case 3: two balanced grid programs (both v7x TensorCores), exact tiling.
    check(k3, (2, 128, INPUT_DIM), "case 3")
    # Case 4: ragged row count -> exercises the masked out-of-bounds tail block.
    check(k4, (2, 100, INPUT_DIM), "case 4")

    print("KERNEL_OK")
</pallas_src>

<mosaic_0001>
module attributes {stable_mosaic.version = 11 : i64} {
  func.func @meta_adapter_kernel(%arg0: i32, %arg1: memref<4x128xf32, #tpu.memory_space<vmem>>, %arg2: memref<128x128xf32, #tpu.memory_space<vmem>>, %arg3: memref<128x64xf32, #tpu.memory_space<vmem>>, %arg4: memref<64x128xf32, #tpu.memory_space<vmem>>, %arg5: memref<8x128xf32, #tpu.memory_space<vmem>>, %arg6: memref<4x128xf32, #tpu.memory_space<vmem>>) attributes {dimension_semantics = [#tpu.dimension_semantics<parallel>], iteration_bounds = array<i64: 1>, scalar_prefetch = 0 : i64, scratch_operands = 0 : i64, tpu.core_type = #tpu.core_type<tc>, window_params = [{transform_indices = @transform_0, window_bounds = array<i64: 4, 128>}, {pipeline_mode = #tpu.pipeline_mode<synchronous>, transform_indices = @transform_1, window_bounds = array<i64: 128, 128>}, {pipeline_mode = #tpu.pipeline_mode<synchronous>, transform_indices = @transform_2, window_bounds = array<i64: 128, 64>}, {pipeline_mode = #tpu.pipeline_mode<synchronous>, transform_indices = @transform_3, window_bounds = array<i64: 64, 128>}, {pipeline_mode = #tpu.pipeline_mode<synchronous>, transform_indices = @transform_4, window_bounds = array<i64: 8, 128>}, {transform_indices = @transform_5, window_bounds = array<i64: 4, 128>}]} {
    %c0 = arith.constant 0 : index
    %c0_0 = arith.constant 0 : index
    %0 = vector.load %arg1[%c0, %c0_0] : memref<4x128xf32, #tpu.memory_space<vmem>>, vector<4x128xf32>
    %c0_1 = arith.constant 0 : index
    %c0_2 = arith.constant 0 : index
    %1 = vector.load %arg2[%c0_1, %c0_2] : memref<128x128xf32, #tpu.memory_space<vmem>>, vector<128x128xf32>
    %cst = arith.constant dense<0.000000e+00> : vector<4x128xf32>
    %2 = tpu.matmul %0, %1, %cst {dimension_numbers = #tpu.dot_dimension_numbers<[1], [0], [0], [1], [0, 0, 1, 1], [], []>, precision = #tpu.contract_precision<fp32>} : vector<4x128xf32>, vector<128x128xf32>, vector<4x128xf32> -> vector<4x128xf32>
    %3 = arith.subf %0, %2 : vector<4x128xf32>
    %4 = arith.mulf %3, %3 : vector<4x128xf32>
    %cst_3 = arith.constant dense<0.000000e+00> : vector<4x128xf32>
    %5 = tpu.matmul %4, %1, %cst_3 {dimension_numbers = #tpu.dot_dimension_numbers<[1], [0], [0], [1], [0, 0, 1, 1], [], []>, precision = #tpu.contract_precision<fp32>} : vector<4x128xf32>, vector<128x128xf32>, vector<4x128xf32> -> vector<4x128xf32>
    %cst_4 = arith.constant 9.99999974E-6 : f32
    %6 = vector.broadcast %cst_4 : f32 to vector<4x128xf32>
    %7 = arith.addf %5, %6 : vector<4x128xf32>
    %8 = math.rsqrt %7 : vector<4x128xf32>
    %9 = arith.mulf %3, %8 : vector<4x128xf32>
    %c2 = arith.constant 2 : index
    %c0_5 = arith.constant 0 : index
    %10 = vector.load %arg5[%c2, %c0_5] : memref<8x128xf32, #tpu.memory_space<vmem>>, vector<1x128xf32>
    %11 = vector.broadcast %10 : vector<1x128xf32> to vector<4x128xf32>
    %12 = arith.mulf %9, %11 : vector<4x128xf32>
    %c3 = arith.constant 3 : index
    %c0_6 = arith.constant 0 : index
    %13 = vector.load %arg5[%c3, %c0_6] : memref<8x128xf32, #tpu.memory_space<vmem>>, vector<1x128xf32>
    %14 = vector.broadcast %13 : vector<1x128xf32> to vector<4x128xf32>
    %15 = arith.addf %12, %14 : vector<4x128xf32>
    %c0_7 = arith.constant 0 : index
    %c0_8 = arith.constant 0 : index
    %16 = vector.load %arg3[%c0_7, %c0_8] : memref<128x64xf32, #tpu.memory_space<vmem>>, vector<128x64xf32>
    %cst_9 = arith.constant dense<0.000000e+00> : vector<4x64xf32>
    %17 = tpu.matmul %15, %16, %cst_9 {dimension_numbers = #tpu.dot_dimension_numbers<[1], [0], [0], [1], [0, 0, 1, 1], [], []>, precision = #tpu.contract_precision<fp32>} : vector<4x128xf32>, vector<128x64xf32>, vector<4x64xf32> -> vector<4x64xf32>
    %c0_10 = arith.constant 0 : index
    %c0_11 = arith.constant 0 : index
    %18 = vector.load %arg5[%c0_10, %c0_11] : memref<8x128xf32, #tpu.memory_space<vmem>>, vector<1x64xf32>
    %19 = vector.broadcast %18 : vector<1x64xf32> to vector<4x64xf32>
    %20 = arith.addf %17, %19 : vector<4x64xf32>
    %cst_12 = arith.constant 0.000000e+00 : f32
    %21 = vector.broadcast %cst_12 : f32 to vector<4x64xf32>
    %22 = arith.subf %21, %20 : vector<4x64xf32>
    %23 = math.exp %22 : vector<4x64xf32>
    %cst_13 = arith.constant 1.000000e+00 : f32
    %24 = vector.broadcast %cst_13 : f32 to vector<4x64xf32>
    %25 = arith.addf %24, %23 : vector<4x64xf32>
    %26 = arith.divf %20, %25 : vector<4x64xf32>
    %c0_14 = arith.constant 0 : index
    %c0_15 = arith.constant 0 : index
    %27 = vector.load %arg4[%c0_14, %c0_15] : memref<64x128xf32, #tpu.memory_space<vmem>>, vector<64x128xf32>
    %cst_16 = arith.constant dense<0.000000e+00> : vector<4x128xf32>
    %28 = tpu.matmul %26, %27, %cst_16 {dimension_numbers = #tpu.dot_dimension_numbers<[1], [0], [0], [1], [0, 0, 1, 1], [], []>, precision = #tpu.contract_precision<fp32>} : vector<4x64xf32>, vector<64x128xf32>, vector<4x128xf32> -> vector<4x128xf32>
    %c1 = arith.constant 1 : index
    %c0_17 = arith.constant 0 : index
    %29 = vector.load %arg5[%c1, %c0_17] : memref<8x128xf32, #tpu.memory_space<vmem>>, vector<1x128xf32>
    %30 = vector.broadcast %29 : vector<1x128xf32> to vector<4x128xf32>
    %31 = arith.addf %28, %30 : vector<4x128xf32>
    %cst_18 = arith.constant dense<0.000000e+00> : vector<4x128xf32>
    %32 = tpu.matmul %31, %1, %cst_18 {dimension_numbers = #tpu.dot_dimension_numbers<[1], [0], [0], [1], [0, 0, 1, 1], [], []>, precision = #tpu.contract_precision<fp32>} : vector<4x128xf32>, vector<128x128xf32>, vector<4x128xf32> -> vector<4x128xf32>
    %33 = arith.subf %31, %32 : vector<4x128xf32>
    %34 = arith.mulf %33, %33 : vector<4x128xf32>
    %cst_19 = arith.constant dense<0.000000e+00> : vector<4x128xf32>
    %35 = tpu.matmul %34, %1, %cst_19 {dimension_numbers = #tpu.dot_dimension_numbers<[1], [0], [0], [1], [0, 0, 1, 1], [], []>, precision = #tpu.contract_precision<fp32>} : vector<4x128xf32>, vector<128x128xf32>, vector<4x128xf32> -> vector<4x128xf32>
    %cst_20 = arith.constant 9.99999974E-6 : f32
    %36 = vector.broadcast %cst_20 : f32 to vector<4x128xf32>
    %37 = arith.addf %35, %36 : vector<4x128xf32>
    %38 = math.rsqrt %37 : vector<4x128xf32>
    %39 = arith.mulf %33, %38 : vector<4x128xf32>
    %c4 = arith.constant 4 : index
    %c0_21 = arith.constant 0 : index
    %40 = vector.load %arg5[%c4, %c0_21] : memref<8x128xf32, #tpu.memory_space<vmem>>, vector<1x128xf32>
    %41 = vector.broadcast %40 : vector<1x128xf32> to vector<4x128xf32>
    %42 = arith.mulf %39, %41 : vector<4x128xf32>
    %c5 = arith.constant 5 : index
    %c0_22 = arith.constant 0 : index
    %43 = vector.load %arg5[%c5, %c0_22] : memref<8x128xf32, #tpu.memory_space<vmem>>, vector<1x128xf32>
    %44 = vector.broadcast %43 : vector<1x128xf32> to vector<4x128xf32>
    %45 = arith.addf %42, %44 : vector<4x128xf32>
    %46 = arith.addf %45, %0 : vector<4x128xf32>
    %c0_23 = arith.constant 0 : index
    %c0_24 = arith.constant 0 : index
    %47 = vector.load %arg6[%c0_23, %c0_24] : memref<4x128xf32, #tpu.memory_space<vmem>>, vector<4x128xf32>
    tpu.vector_store %arg6[%c0_23, %c0_24], %46 {strides = array<i32>} : memref<4x128xf32, #tpu.memory_space<vmem>>, vector<4x128xf32>,
    return
  }
  func.func @transform_0(%arg0: i32) -> (i32, i32) {
    %c0_i32 = arith.constant 0 : i32
    %c0_i32_0 = arith.constant 0 : i32
    return %arg0, %c0_i32 : i32, i32
  }
  func.func @transform_1(%arg0: i32) -> (i32, i32) {
    %c0_i32 = arith.constant 0 : i32
    %c0_i32_0 = arith.constant 0 : i32
    %c0_i32_1 = arith.constant 0 : i32
    return %c0_i32, %c0_i32_0 : i32, i32
  }
  func.func @transform_2(%arg0: i32) -> (i32, i32) {
    %c0_i32 = arith.constant 0 : i32
    %c0_i32_0 = arith.constant 0 : i32
    %c0_i32_1 = arith.constant 0 : i32
    return %c0_i32, %c0_i32_0 : i32, i32
  }
  func.func @transform_3(%arg0: i32) -> (i32, i32) {
    %c0_i32 = arith.constant 0 : i32
    %c0_i32_0 = arith.constant 0 : i32
    %c0_i32_1 = arith.constant 0 : i32
    return %c0_i32, %c0_i32_0 : i32, i32
  }
  func.func @transform_4(%arg0: i32) -> (i32, i32) {
    %c0_i32 = arith.constant 0 : i32
    %c0_i32_0 = arith.constant 0 : i32
    %c0_i32_1 = arith.constant 0 : i32
    return %c0_i32, %c0_i32_0 : i32, i32
  }
  func.func @transform_5(%arg0: i32) -> (i32, i32) {
    %c0_i32 = arith.constant 0 : i32
    %c0_i32_0 = arith.constant 0 : i32
    return %arg0, %c0_i32 : i32, i32
  }
}

</mosaic_0001>

<bundles_post_ra>
// kernel: tile.38
= control target key start
LH: loop header
LB: loop body
LE: loop exit
PB: predicated region body
PF: predicated region fallthrough
CT: control target
= control target key end

     0   :  { %s22_s0 = inlined_call_operand.vmem [shape: f32[32], index: 0, kind: input, shape index: {}]   ;;  %s23_s1 = inlined_call_operand.vmem [shape: f32[4,32], index: 1, kind: output, shape index: {}]  }
   0x1   :  { %v4_v0 = vld [vmem:[%s22_s0] ss:$0 sm:$0xff] }
   0x2   :  { %5 = vst [vmem:[%s23_s1] sm:$0xf] %v4_v0 }

// kernel: tile.33
= control target key start
LH: loop header
LB: loop body
LE: loop exit
PB: predicated region body
PF: predicated region fallthrough
CT: control target
= control target key end

     0   :  { %s22_s0 = inlined_call_operand.vmem [shape: f32[16], index: 0, kind: input, shape index: {}]   ;;  %s23_s1 = inlined_call_operand.vmem [shape: f32[4,16], index: 1, kind: output, shape index: {}]  }
   0x1   :  { %v4_v0 = vld [vmem:[%s22_s0] ss:$0 sm:$0xff] }
   0x2   :  { %5 = vst [vmem:[%s23_s1] sm:$0xf] %v4_v0 }

// kernel: tile.34
= control target key start
LH: loop header
LB: loop body
LE: loop exit
PB: predicated region body
PF: predicated region fallthrough
CT: control target
= control target key end

     0   :  { %vm7_vm0 = vcmask 130048   ;;  %s37_s8 = smov 16   ;;  %s38_s9 = smov 32   ;;  %vm13_vm1 = vcmask 523648   ;;  %vm19_vm2 = vcmask 392448   ;;  %vm25_vm3 = vcmask 261248   ;;  %s55_s0 = inlined_call_operand.vmem [shape: f32[4,16], index: 0, kind: input, shape index: {}]   ;;  %s56_s1 = inlined_call_operand.vmem [shape: f32[64], index: 1, kind: output, shape index: {}]  }
   0x1   :  { %v4_v0 = vld [vmem:[%s55_s0] sm:$0xf]  ;;  %s36_s0 = smov 48  }
   0x2   :  { %5 = vst [vmem:[#allocation1] sm:$0xf] %v4_v0 }
   0x9   :  { %v10_v1 = vld [vmem:[#allocation1 + $0x3] sm:$0x1]   ;;  %v22_v2 = vld [vmem:[#allocation1 + $0x1] sm:$0x1]   ;;  %v6_v3 = vld [vmem:[#allocation1] sm:$0x1]  }
   0xa   :  { %11 = vrot.lane.b32.xlu0 %v10_v1, %s36_s0  ;;  %23 = vrot.lane.b32.xlu1 %v22_v2, %s37_s8  ;;  %v16_v4 = vld [vmem:[#allocation1 + $0x2] sm:$0x1]   ;;  %8 = vst.msk [vmem:[#allocation0] sm:$0x1] %vm7_vm0, %v6_v3  }
   0xe   :  { %17 = vrot.lane.b32.xlu0 %v16_v4, %s38_s9 }
  0x7c   :  { %v12_v5 = vpop.permute.xlu0 %11   ;;  %v24_v6 = vpop.permute.xlu1 %23  }
  0x7d   :  { %14 = vst.msk [vmem:[#allocation0] sm:$0x1] %vm13_vm1, %v12_v5  }
  0x80   :  { %v18_v7 = vpop.permute.xlu0 %17  }
  0x81   :  { %20 = vst.msk [vmem:[#allocation0] sm:$0x1] %vm19_vm2, %v18_v7  }
  0x82   :  { %26 = vst.msk [vmem:[#allocation0] sm:$0x1] %vm25_vm3, %v24_v6  }
  0x89   :  { %v30_v8 = vld [vmem:[#allocation0] sm:$0x1] }
  0x8a   :  { %32 = vst [vmem:[%s56_s1] sm:$0x1] %v30_v8 }

// kernel: meta_adapter_forward.1
= control target key start
LH: loop header
LB: loop body
LE: loop exit
PB: predicated region body
PF: predicated region fallthrough
CT: control target
= control target key end

     0   :  { %v7689_v0 = vmov 0.0|0.0   ;;  %vm6463_vm0 = vmmov 0   ;;  %v7681_v4 = vmov 0.0   ;;  %vm2016_vm1 = vcmask 523264   ;;  %s7675_s1 = inlined_call_operand.vmem [shape: f32[128,128], index: 1, kind: input, shape index: {}]   ;;  %s7676_s0 = inlined_call_operand.vmem [shape: f32[4,128], index: 0, kind: input, shape index: {}]   ;;  %s7677_s2 = inlined_call_operand.vmem [shape: f32[128,64], index: 2, kind: input, shape index: {}]   ;;  %s7678_s4 = inlined_call_operand.vmem [shape: f32[8,128], index: 4, kind: input, shape index: {}]   ;;  %s7679_s3 = inlined_call_operand.vmem [shape: f32[64,128], index: 3, kind: input, shape index: {}]   ;;  %s7680_s5 = inlined_call_operand.vmem [shape: f32[4,128], index: 5, kind: output, shape index: {}]  }
   0x1   :  { %5619 = vmatprep.subr.bf16.mxu0 %v7689_v0  ;;  %v21_v1 = vld [vmem:[%s7675_s1] sm:$0xff]  ;;  %v22_v2 = vld [vmem:[%s7675_s1 + $0x8] sm:$0xff]  ;;  %v23_v3 = vld [vmem:[%s7675_s1 + $0x10] sm:$0xff]  ;;  %4498 = vmatprep.mubr.msk.f32.mxu0 %vm6463_vm0, %v7681_v4 }
   0x2   :  { %v38_v5 = vand.u32 4294901760, %v21_v1  ;;  %v41_v6 = vand.u32 4294901760, %v22_v2  ;;  %v24_v7 = vld [vmem:[%s7675_s1 + $0x18] sm:$0xff]  ;;  %v44_v8 = vand.u32 4294901760, %v23_v3  ;;  %v25_v9 = vld [vmem:[%s7675_s1 + $0x20] sm:$0xff]  ;;  %v26_v10 = vld [vmem:[%s7675_s1 + $0x28] sm:$0xff]  ;;  %5595 = vmatprep.subr.bf16.mxu1 %v7689_v0  ;;  %4463 = vmatprep.mubr.msk.f32.mxu1 %vm6463_vm0, %v7681_v4 }
   0x3   :  { %v47_v11 = vand.u32 4294901760, %v24_v7  ;;  %v50_v12 = vand.u32 4294901760, %v25_v9  ;;  %v53_v13 = vand.u32 4294901760, %v26_v10  ;;  %v27_v18 = vld [vmem:[%s7675_s1 + $0x30] sm:$0xff]  ;;  %v28_v19 = vld [vmem:[%s7675_s1 + $0x38] sm:$0xff]  ;;  %v29_v38 = vld [vmem:[%s7675_s1 + $0x40] sm:$0xff] }
   0x4   :  { %v6519_v14 = vpack.c.bf16 %v41_v6, %v38_v5  ;;  %v6521_v15 = vsub.f32 %v21_v1, %v38_v5  ;;  %v6523_v16 = vsub.f32 %v22_v2, %v41_v6  ;;  %v6525_v17 = vsub.f32 %v23_v3, %v44_v8  ;;  %v30_v39 = vld [vmem:[%s7675_s1 + $0x48] sm:$0xff]  ;;  %v6578_v44 = vld [vmem:[%s7675_s1 + $0x50] sm:$0xff]  ;;  %v32_v53 = vld [vmem:[%s7675_s1 + $0x58] sm:$0xff] }
   0x5   :  { %v6533_v20 = vpack.c.bf16 %v47_v11, %v44_v8  ;;  %v6535_v21 = vsub.f32 %v24_v7, %v47_v11  ;;  %v6537_v22 = vsub.f32 %v25_v9, %v50_v12  ;;  %v6542_v26 = vsub.f32 %v26_v10, %v53_v13  ;;  %v33_v58 = vld [vmem:[%s7675_s1 + $0x60] sm:$0xff]  ;;  %v34_v59 = vld [vmem:[%s7675_s1 + $0x68] sm:$0xff] }
   0x6   :  { %v131_v23 = vand.u32 4294901760, %v6521_v15  ;;  %v138_v24 = vand.u32 4294901760, %v6523_v16  ;;  %v145_v25 = vand.u32 4294901760, %v6525_v17  ;;  %5597 = vmatpush3.bf16.msra.mxu1 %v6519_v14  ;;  %v56_v29 = vand.u32 4294901760, %v27_v18 }
   0x7   :  { %v152_v27 = vand.u32 4294901760, %v6535_v21  ;;  %v159_v28 = vand.u32 4294901760, %v6537_v22  ;;  %v59_v30 = vand.u32 4294901760, %v28_v19  ;;  %5598 = vmatprep.subr.bf16.mxu1 %v7689_v0  ;;  %v166_v34 = vand.u32 4294901760, %v6542_v26 }
   0x8   :  { %v132_v31 = vsub.f32 %v6521_v15, %v131_v23  ;;  %v139_v32 = vsub.f32 %v6523_v16, %v138_v24  ;;  %v146_v33 = vsub.f32 %v6525_v17, %v145_v25  ;;  %v6564_v37 = vsub.f32 %v27_v18, %v56_v29 }
   0x9   :  { %v153_v35 = vsub.f32 %v6535_v21, %v152_v27  ;;  %v160_v36 = vsub.f32 %v6537_v22, %v159_v28  ;;  %v167_v43 = vsub.f32 %v6542_v26, %v166_v34  ;;  %v6581_v46 = vpack.c.bf16 %v53_v13, %v50_v12  ;;  %v6631_v13 = vld [vmem:[%s7675_s1 + $0x70] sm:$0xff] }
   0xa   :  { %v133_v40 = vand.u32 4294901760, %v132_v31  ;;  %v140_v41 = vand.u32 4294901760, %v139_v32  ;;  %v147_v42 = vand.u32 4294901760, %v146_v33  ;;  %5600 = vmatpush3.bf16.msra.mxu1 %v6533_v20  ;;  %v173_v47 = vand.u32 4294901760, %v6564_v37  ;;  %v36_v31 = vld [vmem:[%s7675_s1 + $0x78] sm:$0xff] }
   0xb   :  { %v154_v45 = vand.u32 4294901760, %v153_v35  ;;  %v6584_v48 = vsub.f32 %v28_v19, %v59_v30  ;;  %5601 = vmatprep.subr.bf16.mxu1 %v7689_v0  ;;  %v161_v50 = vand.u32 4294901760, %v160_v36  ;;  %v62_v51 = vand.u32 4294901760, %v29_v38 }
   0xc   :  { %v6587_v49 = vpack.c.bf16 %v140_v41, %v133_v40  ;;  %v65_v52 = vand.u32 4294901760, %v30_v39  ;;  %v168_v54 = vand.u32 4294901760, %v167_v43  ;;  %v174_v55 = vsub.f32 %v6564_v37, %v173_v47 }
   0xd   :  { %v180_v56 = vand.u32 4294901760, %v6584_v48  ;;  %v68_v57 = vand.u32 4294901760, %v6578_v44  ;;  %v6604_v60 = vpack.c.bf16 %v154_v45, %v147_v42  ;;  %v6606_v61 = vsub.f32 %v29_v38, %v62_v51 }
   0xe   :  { %5621 = vmatpush3.bf16.msra.mxu0 %v6587_v49  ;;  %v6608_v62 = vsub.f32 %v30_v39, %v65_v52  ;;  %v6611_v63 = vpack.c.bf16 %v59_v30, %v56_v29  ;;  %v71_v2 = vand.u32 4294901760, %v32_v53  ;;  %5603 = vmatpush3.bf16.msra.mxu1 %v6581_v46  ;;  %v74_v7 = vand.u32 4294901760, %v33_v58 }
   0xf   :  { %5622 = vmatprep.subr.bf16.mxu0 %v7689_v0  ;;  %v181_v1 = vsub.f32 %v6584_v48, %v180_v56  ;;  %v6617_v3 = vsub.f32 %v6578_v44, %v68_v57  ;;  %v187_v5 = vand.u32 4294901760, %v6606_v61  ;;  %v77_v8 = vand.u32 4294901760, %v34_v59  ;;  %5604 = vmatprep.subr.bf16.mxu1 %v7689_v0 }
  0x10   :  { %v194_v6 = vand.u32 4294901760, %v6608_v62  ;;  %v6623_v9 = vpack.c.bf16 %v168_v54, %v161_v50  ;;  %v175_v10 = vand.u32 4294901760, %v174_v55  ;;  %v6626_v12 = vsub.f32 %v32_v53, %v71_v2 }
  0x11   :  { %v201_v11 = vand.u32 4294901760, %v6617_v3  ;;  %v182_v18 = vand.u32 4294901760, %v181_v1  ;;  %v188_v19 = vsub.f32 %v6606_v61, %v187_v5  ;;  %v6636_v30 = vsub.f32 %v33_v58, %v74_v7 }
  0x12   :  { %7745 = vst [vmem:[#allocation2_spill] sm:$0xff] %v6623_v9  ;;  %5624 = vmatpush3.bf16.msra.mxu0 %v6604_v60  ;;  %v195_v29 = vsub.f32 %v6608_v62, %v194_v6  ;;  %v208_v32 = vand.u32 4294901760, %v6626_v12  ;;  %v6643_v33 = vsub.f32 %v34_v59, %v77_v8  ;;  %5606 = vmatpush3.bf16.msra.mxu1 %v6611_v63  ;;  %v80_v38 = vand.u32 4294901760, %v6631_v13 }
  0x13   :  { %5625 = vmatprep.subr.bf16.mxu0 %v7689_v0  ;;  %v202_v35 = vsub.f32 %v6617_v3, %v201_v11  ;;  %v215_v36 = vand.u32 4294901760, %v6636_v30  ;;  %5607 = vmatprep.subr.bf16.mxu1 %v7689_v0  ;;  %v6650_v39 = vpack.c.bf16 %v65_v52, %v62_v51  ;;  %v83_v42 = vand.u32 4294901760, %v36_v31 }
  0x14   :  { %v209_v40 = vsub.f32 %v6626_v12, %v208_v32  ;;  %v222_v41 = vand.u32 4294901760, %v6643_v33  ;;  %v6655_v43 = vpack.c.bf16 %v182_v18, %v175_v10  ;;  %v189_v44 = vand.u32 4294901760, %v188_v19 }
  0x15   :  { %v196_v45 = vand.u32 4294901760, %v195_v29  ;;  %v6658_v50 = vsub.f32 %v6631_v13, %v80_v38  ;;  %v216_v53 = vsub.f32 %v6636_v30, %v215_v36  ;;  %v6662_v51 = vsub.f32 %v36_v31, %v83_v42 }
  0x16   :  { %5627 = vmatpush3.bf16.msra.mxu0 %v6623_v9  ;;  %7746 = vst [vmem:[#allocation3_spill] sm:$0xff] %v6655_v43  ;;  %5609 = vmatpush3.bf16.msra.mxu1 %v6650_v39  ;;  %v203_v52 = vand.u32 4294901760, %v202_v35  ;;  %v210_v54 = vand.u32 4294901760, %v209_v40  ;;  %v223_v55 = vsub.f32 %v6643_v33, %v222_v41  ;;  %v6671_v1 = vpack.c.bf16 %v71_v2, %v68_v57 }
  0x17   :  { %5628 = vmatprep.subr.bf16.mxu0 %v7689_v0  ;;  %5610 = vmatprep.subr.bf16.mxu1 %v7689_v0  ;;  %v229_v58 = vand.u32 4294901760, %v6658_v50  ;;  %v6669_v59 = vpack.c.bf16 %v196_v45, %v189_v44  ;;  %v236_v10 = vand.u32 4294901760, %v6662_v51  ;;  %v6675_v13 = vpack.c.bf16 %v77_v8, %v74_v7 }
  0x18   :  { %v217_v18 = vand.u32 4294901760, %v216_v53  ;;  %v6677_v19 = vpack.c.bf16 %v210_v54, %v203_v52  ;;  %v224_v29 = vand.u32 4294901760, %v223_v55  ;;  %v6683_v31 = vpack.c.bf16 %v138_v24, %v131_v23  ;;  %v1336_v52 = vld [vmem:[%s7677_s2 + $0x8] sm:$0xff] }
  0x19   :  { %7747 = vst [vmem:[#allocation4_spill] sm:$0xff] %v6669_v59  ;;  %v6689_v57 = vpack.c.bf16 %v152_v27, %v145_v25  ;;  %v230_v2 = vsub.f32 %v6658_v50, %v229_v58  ;;  %v6697_v7 = vpack.c.bf16 %v166_v34, %v159_v28  ;;  %v6703_v23 = vpack.c.bf16 %v180_v56, %v173_v47  ;;  %v6713_v27 = vld [vmem:[%s7676_s0] sm:$0xf] }
  0x1a   :  { %5630 = vmatpush3.bf16.msra.mxu0 %v6655_v43  ;;  %7748 = vst [vmem:[#allocation5_spill] sm:$0xff] %v6677_v19  ;;  %7749 = vst [vmem:[#allocation6_spill] sm:$0xff] %v6683_v31  ;;  %5612 = vmatpush3.bf16.msra.mxu1 %v6671_v1  ;;  %v6705_v24 = vpack.c.bf16 %v194_v6, %v187_v5  ;;  %v237_v25 = vsub.f32 %v6662_v51, %v236_v10  ;;  %v6724_v47 = vand.u32 4294901760, %v6713_v27 }
  0x1b   :  { %5631 = vmatprep.subr.bf16.mxu0 %v7689_v0  ;;  %7750 = vst [vmem:[#allocation7_spill] sm:$0xff] %v6689_v57  ;;  %7751 = vst [vmem:[#allocation8_spill] sm:$0xff] %v6697_v7  ;;  %5613 = vmatprep.subr.bf16.mxu1 %v7689_v0  ;;  %v6715_v28 = vpack.c.bf16 %v208_v32, %v201_v11  ;;  %v6717_v34 = vpack.c.bf16 %v222_v41, %v215_v36  ;;  %v231_v6 = vand.u32 4294901760, %v230_v2  ;;  %v1338_v2 = vld [vmem:[%s7677_s2 + $0x18] sm:$0xff] }
  0x1c   :  { %7752 = vst [vmem:[#allocation9_spill] sm:$0xff] %v6703_v23  ;;  %7753 = vst [vmem:[#allocation10_spill] sm:$0xff] %v6705_v24  ;;  %v6719_v8 = vpack.c.bf16 %v236_v10, %v229_v58  ;;  %v6728_v56 = vpack.c.bf16 %v224_v29, %v217_v18  ;;  %v6730_v5 = vpack.c.bf16 %v83_v42, %v80_v38  ;;  %v238_v11 = vand.u32 4294901760, %v237_v25  ;;  %v1337_v29 = vld [vmem:[%s7677_s2 + $0x10] sm:$0xff] }
  0x1d   :  { %7754 = vst [vmem:[#allocation11_spill] sm:$0xff] %v6715_v28  ;;  %7755 = vst [vmem:[#allocation12_spill] sm:$0xff] %v6717_v34  ;;  %v6735_v32 = vsub.f32 %v6713_v27, %v6724_v47  ;;  %v6750_v40 = vpack.c.bf16 %v6523_v16, %v6521_v15  ;;  %v6758_v42 = vpack.c.bf16 %v6535_v21, %v6525_v17  ;;  %v1360_v55 = vand.u32 4294901760, %v1336_v52 }
  0x1e   :  { %5633 = vmatpush3.bf16.msra.mxu0 %v6669_v59  ;;  %7756 = vst [vmem:[#allocation13_spill] sm:$0xff] %v6719_v8  ;;  %5615 = vmatpush3.bf16.msra.mxu1 %v6675_v13  ;;  %7757 = vst [vmem:[#allocation14_spill] sm:$0xff] %v6728_v56  ;;  %v6740_v35 = vpack.c.bf16 %v238_v11, %v231_v6  ;;  %v6770_v15 = vpack.c.bf16 %v6542_v26, %v6537_v22  ;;  %v1363_v25 = vand.u32 4294901760, %v1337_v29  ;;  %v1339_v6 = vld [vmem:[%s7677_s2 + $0x20] sm:$0xff]  ;;  %v1340_v11 = vld [vmem:[%s7677_s2 + $0x28] sm:$0xff] }
  0x1f   :  { %5634 = vmatprep.subr.bf16.mxu0 %v7689_v0  ;;  %5616 = vmatprep.subr.bf16.mxu1 %v7689_v0  ;;  %v120_v36 = vand.u32 4294901760, %v6735_v32  ;;  %7759 = vst [vmem:[#allocation16_spill] sm:$0xff] %v6750_v40  ;;  %7760 = vst [vmem:[#allocation17_spill] sm:$0xff] %v6758_v42  ;;  %v6778_v16 = vpack.c.bf16 %v6584_v48, %v6564_v37  ;;  %v6786_v17 = vpack.c.bf16 %v6608_v62, %v6606_v61 }
  0x20   :  { %7758 = vst [vmem:[#allocation15_spill] sm:$0xff] %v6740_v35  ;;  %7761 = vst [vmem:[#allocation18_spill] sm:$0xff] %v6770_v15  ;;  %v6794_v21 = vpack.c.bf16 %v6626_v12, %v6617_v3  ;;  %v6802_v22 = vpack.c.bf16 %v6643_v33, %v6636_v30  ;;  %v6810_v26 = vpack.c.bf16 %v6662_v51, %v6658_v50  ;;  %v1335_v51 = vld [vmem:[%s7677_s2] sm:$0xff] }
  0x21   :  { %v121_v38 = vsub.f32 %v6735_v32, %v120_v36  ;;  %7762 = vst [vmem:[#allocation19_spill] sm:$0xff] %v6778_v16  ;;  %7763 = vst [vmem:[#allocation20_spill] sm:$0xff] %v6786_v17  ;;  %v1357_v54 = vand.u32 4294901760, %v1335_v51  ;;  %v6926_v18 = vsub.f32 %v1336_v52, %v1360_v55 }
  0x22   :  { %5636 = vmatpush3.bf16.msra.mxu0 %v6677_v19  ;;  %5618 = vmatpush3.bf16.msra.mxu1 %v6730_v5  ;;  %7764 = vst [vmem:[#allocation21_spill] sm:$0xff] %v6794_v21  ;;  %7765 = vst [vmem:[#allocation22_spill] sm:$0xff] %v6802_v22 }
  0x23   :  { %5637 = vmatprep.subr.bf16.mxu0 %v7689_v0  ;;  %5739 = vmatprep.subr.bf16.mxu1 %v7689_v0  ;;  %v122_v41 = vand.u32 4294901760, %v121_v38  ;;  %7766 = vst [vmem:[#allocation23_spill] sm:$0xff] %v6810_v26  ;;  %v6922_v58 = vpack.c.bf16 %v1360_v55, %v1357_v54  ;;  %v6924_v10 = vsub.f32 %v1335_v51, %v1357_v54 }
  0x24   :  { %v7051_v54 = vsub.f32 %v1337_v29, %v1363_v25 }
  0x25   :  { %4464 = vmatmul.mubr.f32.vlgmr.msra.gmra.mrb[0].mxu1 %v122_v41  ;;  %v1341_v41 = vld [vmem:[%s7677_s2 + $0x30] sm:$0xff] }
  0x26   :  { %5639 = vmatpush3.bf16.msra.mxu0 %v6728_v56  ;;  %5741 = vmatpush3.bf16.msra.mxu1 %v6519_v14 }
  0x27   :  { %5640 = vmatprep.subr.bf16.mxu0 %v7689_v0  ;;  %5742 = vmatprep.subr.bf16.mxu1 %v7689_v0 }
  0x28   :  { %4673 = vmatprep.mubr.msk.f32.mxu1 %vm6463_vm0, %v7681_v4 }
  0x2a   :  { %5642 = vmatpush3.bf16.msra.mxu0 %v6740_v35  ;;  %5744 = vmatpush3.bf16.msra.mxu1 %v6533_v20 }
  0x2b   :  { %5643 = vmatprep.subr.bf16.mxu0 %v7689_v0  ;;  %5745 = vmatprep.subr.bf16.mxu1 %v7689_v0 }
  0x2d   :  { %4499 = vmatmul.mubr.f32.vlgmr.msra.gmra.mrb[0].mxu0 %v6724_v47 }
  0x2e   :  { %5645 = vmatpush3.bf16.msra.mxu0 %v6750_v40  ;;  %4533 = vmatprep.mubr.msk.f32.mxu0 %vm6463_vm0, %v7681_v4 }
  0x2f   :  { %5646 = vmatprep.subr.bf16.mxu0 %v7689_v0  ;;  %5747 = vmatpush3.bf16.msra.mxu1 %v6581_v46 }
  0x30   :  { %5748 = vmatprep.subr.bf16.mxu1 %v7689_v0 }
  0x32   :  { %5648 = vmatpush3.bf16.msra.mxu0 %v6758_v42 }
  0x33   :  { %5649 = vmatprep.subr.bf16.mxu0 %v7689_v0  ;;  %5750 = vmatpush3.bf16.msra.mxu1 %v6611_v63 }
  0x34   :  { %5751 = vmatprep.subr.bf16.mxu1 %v7689_v0 }
  0x36   :  { %5651 = vmatpush3.bf16.msra.mxu0 %v6770_v15 }
  0x37   :  { %5652 = vmatprep.subr.bf16.mxu0 %v7689_v0  ;;  %5753 = vmatpush3.bf16.msra.mxu1 %v6650_v39 }
  0x38   :  { %5754 = vmatprep.subr.bf16.mxu1 %v7689_v0 }
  0x3a   :  { %5654 = vmatpush3.bf16.msra.mxu0 %v6778_v16 }
  0x3b   :  { %5655 = vmatprep.subr.bf16.mxu0 %v7689_v0  ;;  %5756 = vmatpush3.bf16.msra.mxu1 %v6671_v1 }
  0x3c   :  { %5757 = vmatprep.subr.bf16.mxu1 %v7689_v0 }
  0x3e   :  { %5657 = vmatpush3.bf16.msra.mxu0 %v6786_v17 }
  0x3f   :  { %5658 = vmatprep.subr.bf16.mxu0 %v7689_v0  ;;  %5759 = vmatpush3.bf16.msra.mxu1 %v6675_v13 }
  0x40   :  { %5760 = vmatprep.subr.bf16.mxu1 %v7689_v0 }
  0x42   :  { %5660 = vmatpush3.bf16.msra.mxu0 %v6794_v21 }
  0x43   :  { %5661 = vmatprep.subr.bf16.mxu0 %v7689_v0  ;;  %5762 = vmatpush3.bf16.msra.mxu1 %v6730_v5 }
  0x44   :  { %5763 = vmatprep.subr.bf16.mxu1 %v7689_v0 }
  0x46   :  { %5663 = vmatpush3.bf16.msra.mxu0 %v6802_v22 }
  0x47   :  { %5664 = vmatprep.subr.bf16.mxu0 %v7689_v0 }
  0x4a   :  { %5666 = vmatpush3.bf16.msra.mxu0 %v6810_v26 }
  0x4b   :  { %5667 = vmatprep.subr.bf16.mxu0 %v7689_v0 }
  0x4d   :  { %4534 = vmatmul.mubr.f32.vlgmr.msra.gmra.mrb[0].mxu0 %v6735_v32  ;;  %v1369_v32 = vand.u32 4294901760, %v1339_v6 }
  0x4e   :  { %5669 = vmatpush3.bf16.msra.mxu0 %v6519_v14  ;;  %4568 = vmatprep.mubr.msk.f32.mxu0 %vm6463_vm0, %v7681_v4 }
  0x4f   :  { %5670 = vmatprep.subr.bf16.mxu0 %v7689_v0 }
  0x52   :  { %5672 = vmatpush3.bf16.msra.mxu0 %v6533_v20 }
  0x53   :  { %5673 = vmatprep.subr.bf16.mxu0 %v7689_v0 }
  0x56   :  { %5675 = vmatpush3.bf16.msra.mxu0 %v6581_v46 }
  0x57   :  { %5676 = vmatprep.subr.bf16.mxu0 %v7689_v0 }
  0x5a   :  { %5678 = vmatpush3.bf16.msra.mxu0 %v6611_v63 }
  0x5b   :  { %5679 = vmatprep.subr.bf16.mxu0 %v7689_v0 }
  0x5e   :  { %5681 = vmatpush3.bf16.msra.mxu0 %v6650_v39 }
  0x5f   :  { %5682 = vmatprep.subr.bf16.mxu0 %v7689_v0 }
  0x62   :  { %5684 = vmatpush3.bf16.msra.mxu0 %v6671_v1 }
  0x63   :  { %5685 = vmatprep.subr.bf16.mxu0 %v7689_v0 }
  0x66   :  { %5687 = vmatpush3.bf16.msra.mxu0 %v6675_v13 }
  0x67   :  { %5688 = vmatprep.subr.bf16.mxu0 %v7689_v0 }
  0x6a   :  { %5690 = vmatpush3.bf16.msra.mxu0 %v6730_v5 }
  0x6b   :  { %5691 = vmatprep.subr.bf16.mxu0 %v7689_v0 }
  0x6d   :  { %4569 = vmatmul.mubr.f32.vlgmr.msra.gmra.mrb[0].mxu0 %v120_v36  ;;  %v1372_v36 = vand.u32 4294901760, %v1340_v11 }
  0x6e   :  { %5693 = vmatpush3.bf16.msra.mxu0 %v6683_v31  ;;  %4603 = vmatprep.mubr.msk.f32.mxu0 %vm6463_vm0, %v7681_v4 }
  0x6f   :  { %5694 = vmatprep.subr.bf16.mxu0 %v7689_v0  ;;  %v7021_v38 = vpack.c.bf16 %v1372_v36, %v1369_v32 }
  0x72   :  { %5696 = vmatpush3.bf16.msra.mxu0 %v6689_v57 }
  0x73   :  { %5697 = vmatprep.subr.bf16.mxu0 %v7689_v0 }
  0x76   :  { %5699 = vmatpush3.bf16.msra.mxu0 %v6697_v7 }
  0x77   :  { %5700 = vmatprep.subr.bf16.mxu0 %v7689_v0 }
  0x7a   :  { %5702 = vmatpush3.bf16.msra.mxu0 %v6703_v23 }
  0x7b   :  { %5703 = vmatprep.subr.bf16.mxu0 %v7689_v0 }
  0x7e   :  { %5705 = vmatpush3.bf16.msra.mxu0 %v6705_v24 }
  0x7f   :  { %5706 = vmatprep.subr.bf16.mxu0 %v7689_v0 }
  0x82   :  { %5708 = vmatpush3.bf16.msra.mxu0 %v6715_v28 }
  0x83   :  { %5709 = vmatprep.subr.bf16.mxu0 %v7689_v0 }
  0x86   :  { %5711 = vmatpush3.bf16.msra.mxu0 %v6717_v34 }
  0x87   :  { %5712 = vmatprep.subr.bf16.mxu0 %v7689_v0 }
  0x8a   :  { %5714 = vmatpush3.bf16.msra.mxu0 %v6719_v8 }
  0x8b   :  { %5715 = vmatprep.subr.bf16.mxu0 %v7689_v0 }
  0x8d   :  { %4604 = vmatmul.mubr.f32.vlgmr.msra.gmra.mrb[0].mxu0 %v6724_v47 }
  0x8e   :  { %5717 = vmatpush3.bf16.msra.mxu0 %v6519_v14  ;;  %4638 = vmatprep.mubr.msk.f32.mxu0 %vm6463_vm0, %v7681_v4 }
  0x8f   :  { %5718 = vmatprep.subr.bf16.mxu0 %v7689_v0 }
  0x92   :  { %5720 = vmatpush3.bf16.msra.mxu0 %v6533_v20 }
  0x93   :  { %5721 = vmatprep.subr.bf16.mxu0 %v7689_v0 }
  0x96   :  { %5723 = vmatpush3.bf16.msra.mxu0 %v6581_v46 }
  0x97   :  { %5724 = vmatprep.subr.bf16.mxu0 %v7689_v0 }
  0x9a   :  { %5726 = vmatpush3.bf16.msra.mxu0 %v6611_v63 }
  0x9b   :  { %5727 = vmatprep.subr.bf16.mxu0 %v7689_v0 }
  0x9e   :  { %5729 = vmatpush3.bf16.msra.mxu0 %v6650_v39 }
  0x9f   :  { %5730 = vmatprep.subr.bf16.mxu0 %v7689_v0 }
  0xa2   :  { %5732 = vmatpush3.bf16.msra.mxu0 %v6671_v1 }
  0xa3   :  { %5733 = vmatprep.subr.bf16.mxu0 %v7689_v0 }
  0xa6   :  { %5735 = vmatpush3.bf16.msra.mxu0 %v6675_v13 }
  0xa7   :  { %5736 = vmatprep.subr.bf16.mxu0 %v7689_v0 }
  0xaa   :  { %5738 = vmatpush3.bf16.msra.mxu0 %v6730_v5 }
  0xab   :  { %5883 = vmatprep.subr.bf16.mxu0 %v7689_v0 }
  0xad   :  { %4639 = vmatmul.mubr.f32.vlgmr.msra.gmra.mrb[0].mxu0 %v6724_v47 }
  0xae   :  { %4883 = vmatprep.mubr.msk.f32.mxu0 %vm6463_vm0, %v7681_v4  ;;  %5885 = vmatpush3.bf16.msra.mxu0 %v6922_v58 }
  0xaf   :  { %5886 = vmatprep.subr.bf16.mxu0 %v7689_v0 }
  0xf8   :  { %v124_v37 = vpop.f32.mrb[0].mxu1 }
  0xf9   :  { %v4465_v48 = vpop.f32.mrb[1].mxu1 }
  0xfa   :  { %v1375_v48 = vand.u32 4294901760, %v1341_v41 }
  0xfc   :  { %v7068_v29 = vsub.f32 %v1341_v41, %v1375_v48 }
 0x180   :  { %v674_v61 = vpop.f32.mrb[0].mxu0 }
 0x181   :  { %v6387_v62 = vadd.f32 %v674_v61, %v124_v37  ;;  %v4640_v3 = vpop.f32.mrb[1].mxu0  ;;  %v1342_v37 = vld [vmem:[%s7677_s2 + $0x38] sm:$0xff] }
 0x182   :  { %v1378_v61 = vand.u32 4294901760, %v1342_v37  ;;  %v1343_v3 = vld [vmem:[%s7677_s2 + $0x40] sm:$0xff] }
 0x183   :  { %v6880_v12 = vsub.f32 %v6713_v27, %v6387_v62  ;;  %v1366_v27 = vand.u32 4294901760, %v1338_v2 }
 0x184   :  { %v7031_v62 = vpack.c.bf16 %v1378_v61, %v1375_v48 }
 0x185   :  { %v679_v30 = vmul.f32 %v6880_v12, %v6880_v12  ;;  %v7011_v47 = vpack.c.bf16 %v1366_v27, %v1363_v25  ;;  %v7053_v55 = vsub.f32 %v1338_v2, %v1366_v27  ;;  %v7070_v2 = vsub.f32 %v1342_v37, %v1378_v61 }
 0x186   :  { %v7767_v61 = vmov 0.0|0.0  }
 0x187   :  { %v6884_v33 = vand.u32 4294901760, %v679_v30  ;;  %5888 = vmatpush3.bf16.msra.mxu0 %v7011_v47 }
 0x188   :  { %5889 = vmatprep.subr.bf16.mxu0 %v7689_v0 }
 0x189   :  { %v6887_v44 = vsub.f32 %v679_v30, %v6884_v33  ;;  %v1344_v30 = vld [vmem:[%s7677_s2 + $0x48] sm:$0xff] }
 0x18b   :  { %v763_v45 = vand.u32 4294901760, %v6887_v44  ;;  %5891 = vmatpush3.bf16.msra.mxu0 %v7021_v38 }
 0x18c   :  { %5892 = vmatprep.subr.bf16.mxu0 %v7689_v0 }
 0x18d   :  { %v764_v50 = vsub.f32 %v6887_v44, %v763_v45 }
 0x18f   :  { %v765_v53 = vand.u32 4294901760, %v764_v50  ;;  %5894 = vmatpush3.bf16.msra.mxu0 %v7031_v62  ;;  %v1345_v50 = vld [vmem:[%s7677_s2 + $0x50] sm:$0xff] }
 0x190   :  { %5895 = vmatprep.subr.bf16.mxu0 %v7689_v0  ;;  %v1387_v51 = vand.u32 4294901760, %v1345_v50 }
 0x191   :  { %4674 = vmatmul.mubr.f32.vlgmr.msra.gmra.mrb[2].mxu1 %v765_v53  ;;  %v1346_v53 = vld [vmem:[%s7677_s2 + $0x58] sm:$0xff] }
 0x192   :  { %5765 = vmatpush3.bf16.msra.mxu1 %v6587_v49  ;;  %4708 = vmatprep.mubr.msk.f32.mxu1 %vm6463_vm0, %v7681_v4  ;;  %v1390_v52 = vand.u32 4294901760, %v1346_v53 }
 0x193   :  { %5766 = vmatprep.subr.bf16.mxu1 %v7689_v0 }
 0x196   :  { %5768 = vmatpush3.bf16.msra.mxu1 %v6604_v60 }
 0x197   :  { %5769 = vmatprep.subr.bf16.mxu1 %v7689_v0 }
 0x19a   :  { %5771 = vmatpush3.bf16.msra.mxu1 %v6623_v9  ;;  %v7768_v9 = vmov 0.0  }
 0x19b   :  { %5772 = vmatprep.subr.bf16.mxu1 %v7689_v0 }
 0x19e   :  { %5774 = vmatpush3.bf16.msra.mxu1 %v6655_v43 }
 0x19f   :  { %5775 = vmatprep.subr.bf16.mxu1 %v7689_v0 }
 0x1a2   :  { %5777 = vmatpush3.bf16.msra.mxu1 %v6669_v59 }
 0x1a3   :  { %5778 = vmatprep.subr.bf16.mxu1 %v7689_v0 }
 0x1a6   :  { %5780 = vmatpush3.bf16.msra.mxu1 %v6677_v19 }
 0x1a7   :  { %5781 = vmatprep.subr.bf16.mxu1 %v7689_v0 }
 0x1aa   :  { %5783 = vmatpush3.bf16.msra.mxu1 %v6728_v56 }
 0x1ab   :  { %5784 = vmatprep.subr.bf16.mxu1 %v7689_v0 }
 0x1ae   :  { %5786 = vmatpush3.bf16.msra.mxu1 %v6740_v35  ;;  %v3862_v35 = vld [vmem:[%s7678_s4 + $0x3] ss:$0 sm:$0xff] }
 0x1af   :  { %5787 = vmatprep.subr.bf16.mxu1 %v7689_v0 }
 0x1b1   :  { %4709 = vmatmul.mubr.f32.vlgmr.msra.gmra.mrb[2].mxu1 %v6884_v33 }
 0x1b2   :  { %5789 = vmatpush3.bf16.msra.mxu1 %v6750_v40  ;;  %4743 = vmatprep.mubr.msk.f32.mxu1 %vm6463_vm0, %v7681_v4 }
 0x1b3   :  { %5790 = vmatprep.subr.bf16.mxu1 %v7689_v0 }
 0x1b6   :  { %5792 = vmatpush3.bf16.msra.mxu1 %v6758_v42  ;;  %v3861_v42 = vld [vmem:[%s7678_s4 + $0x2] ss:$0 sm:$0xff] }
 0x1b7   :  { %5793 = vmatprep.subr.bf16.mxu1 %v7689_v0 }
 0x1ba   :  { %5795 = vmatpush3.bf16.msra.mxu1 %v6770_v15 }
 0x1bb   :  { %5796 = vmatprep.subr.bf16.mxu1 %v7689_v0 }
 0x1be   :  { %5798 = vmatpush3.bf16.msra.mxu1 %v6778_v16 }
 0x1bf   :  { %5799 = vmatprep.subr.bf16.mxu1 %v7689_v0 }
 0x1c2   :  { %5801 = vmatpush3.bf16.msra.mxu1 %v6786_v17 }
 0x1c3   :  { %5802 = vmatprep.subr.bf16.mxu1 %v7689_v0 }
 0x1c6   :  { %5804 = vmatpush3.bf16.msra.mxu1 %v6794_v21 }
 0x1c7   :  { %5805 = vmatprep.subr.bf16.mxu1 %v7689_v0 }
 0x1ca   :  { %5807 = vmatpush3.bf16.msra.mxu1 %v6802_v22 }
 0x1cb   :  { %5808 = vmatprep.subr.bf16.mxu1 %v7689_v0 }
 0x1ce   :  { %5810 = vmatpush3.bf16.msra.mxu1 %v6810_v26 }
 0x1cf   :  { %5811 = vmatprep.subr.bf16.mxu1 %v7689_v0 }
 0x1d1   :  { %4744 = vmatmul.mubr.f32.vlgmr.msra.gmra.mrb[2].mxu1 %v6887_v44  ;;  %v1384_v44 = vand.u32 4294901760, %v1344_v30 }
 0x1d2   :  { %5813 = vmatpush3.bf16.msra.mxu1 %v6519_v14  ;;  %4778 = vmatprep.mubr.msk.f32.mxu1 %vm6463_vm0, %v7681_v4 }
 0x1d3   :  { %5814 = vmatprep.subr.bf16.mxu1 %v7689_v0  ;;  %v7074_v27 = vsub.f32 %v1344_v30, %v1384_v44 }
 0x1d6   :  { %5816 = vmatpush3.bf16.msra.mxu1 %v6533_v20 }
 0x1d7   :  { %5817 = vmatprep.subr.bf16.mxu1 %v7689_v0 }
 0x1da   :  { %5819 = vmatpush3.bf16.msra.mxu1 %v6581_v46 }
 0x1db   :  { %5820 = vmatprep.subr.bf16.mxu1 %v7689_v0 }
 0x1de   :  { %5822 = vmatpush3.bf16.msra.mxu1 %v6611_v63 }
 0x1df   :  { %5823 = vmatprep.subr.bf16.mxu1 %v7689_v0 }
 0x1e2   :  { %5825 = vmatpush3.bf16.msra.mxu1 %v6650_v39 }
 0x1e3   :  { %5826 = vmatprep.subr.bf16.mxu1 %v7689_v0 }
 0x1e6   :  { %5828 = vmatpush3.bf16.msra.mxu1 %v6671_v1 }
 0x1e7   :  { %5829 = vmatprep.subr.bf16.mxu1 %v7689_v0 }
 0x1ea   :  { %5831 = vmatpush3.bf16.msra.mxu1 %v6675_v13 }
 0x1eb   :  { %5832 = vmatprep.subr.bf16.mxu1 %v7689_v0 }
 0x1ee   :  { %5834 = vmatpush3.bf16.msra.mxu1 %v6730_v5 }
 0x1ef   :  { %5835 = vmatprep.subr.bf16.mxu1 %v7689_v0 }
 0x1f1   :  { %4779 = vmatmul.mubr.f32.vlgmr.msra.gmra.mrb[2].mxu1 %v763_v45 }
 0x1f2   :  { %5837 = vmatpush3.bf16.msra.mxu1 %v6683_v31  ;;  %4813 = vmatprep.mubr.msk.f32.mxu1 %vm6463_vm0, %v7681_v4 }
 0x1f3   :  { %5838 = vmatprep.subr.bf16.mxu1 %v7689_v0 }
 0x1f6   :  { %5840 = vmatpush3.bf16.msra.mxu1 %v6689_v57 }
 0x1f7   :  { %5841 = vmatprep.subr.bf16.mxu1 %v7689_v0 }
 0x1fa   :  { %5843 = vmatpush3.bf16.msra.mxu1 %v6697_v7 }
 0x1fb   :  { %5844 = vmatprep.subr.bf16.mxu1 %v7689_v0 }
 0x1fe   :  { %5846 = vmatpush3.bf16.msra.mxu1 %v6703_v23 }
 0x1ff   :  { %5847 = vmatprep.subr.bf16.mxu1 %v7689_v0 }
 0x202   :  { %5849 = vmatpush3.bf16.msra.mxu1 %v6705_v24 }
 0x203   :  { %5850 = vmatprep.subr.bf16.mxu1 %v7689_v0 }
 0x206   :  { %5852 = vmatpush3.bf16.msra.mxu1 %v6715_v28  ;;  %v1348_v28 = vld [vmem:[%s7677_s2 + $0x68] sm:$0xff] }
 0x207   :  { %5853 = vmatprep.subr.bf16.mxu1 %v7689_v0  ;;  %v1396_v23 = vand.u32 4294901760, %v1348_v28 }
 0x209   :  { %v7091_v30 = vsub.f32 %v1348_v28, %v1396_v23  ;;  %v7699_v28 = vand.u32 4294901760, %v7051_v54 }
 0x20a   :  { %5855 = vmatpush3.bf16.msra.mxu1 %v6717_v34  ;;  %v1347_v34 = vld [vmem:[%s7677_s2 + $0x60] sm:$0xff] }
 0x20b   :  { %5856 = vmatprep.subr.bf16.mxu1 %v7689_v0  ;;  %v1393_v24 = vand.u32 4294901760, %v1347_v34 }
 0x20d   :  { %v7086_v37 = vsub.f32 %v1347_v34, %v1393_v24 }
 0x20e   :  { %5858 = vmatpush3.bf16.msra.mxu1 %v6719_v8  ;;  %v7057_v8 = vsub.f32 %v1340_v11, %v1372_v36  ;;  %v7079_v11 = vpack.c.bf16 %v1390_v52, %v1387_v51  ;;  %v7083_v36 = vsub.f32 %v1346_v53, %v1390_v52  ;;  %v7695_v53 = vand.u32 4294901760, %v6926_v18 }
 0x20f   :  { %5859 = vmatprep.subr.bf16.mxu1 %v7689_v0  ;;  %v7702_v52 = vand.u32 4294901760, %v7053_v55  ;;  %v7721_v21 = vand.u32 4294901760, %v7086_v37 }
 0x211   :  { %4814 = vmatmul.mubr.f32.vlgmr.msra.gmra.mrb[2].mxu1 %v6884_v33 }
 0x212   :  { %5861 = vmatpush3.bf16.msra.mxu1 %v6519_v14  ;;  %4848 = vmatprep.mubr.msk.f32.mxu1 %vm6463_vm0, %v7681_v4 }
 0x213   :  { %5862 = vmatprep.subr.bf16.mxu1 %v7689_v0 }
 0x216   :  { %5864 = vmatpush3.bf16.msra.mxu1 %v6533_v20 }
 0x217   :  { %5865 = vmatprep.subr.bf16.mxu1 %v7689_v0 }
 0x21a   :  { %5867 = vmatpush3.bf16.msra.mxu1 %v6581_v46 }
 0x21b   :  { %5868 = vmatprep.subr.bf16.mxu1 %v7689_v0 }
 0x21e   :  { %5870 = vmatpush3.bf16.msra.mxu1 %v6611_v63 }
 0x21f   :  { %5871 = vmatprep.subr.bf16.mxu1 %v7689_v0 }
 0x222   :  { %5873 = vmatpush3.bf16.msra.mxu1 %v6650_v39 }
 0x223   :  { %5874 = vmatprep.subr.bf16.mxu1 %v7689_v0 }
 0x226   :  { %5876 = vmatpush3.bf16.msra.mxu1 %v6671_v1 }
 0x227   :  { %5877 = vmatprep.subr.bf16.mxu1 %v7689_v0 }
 0x22a   :  { %5879 = vmatpush3.bf16.msra.mxu1 %v6675_v13 }
 0x22b   :  { %5880 = vmatprep.subr.bf16.mxu1 %v7689_v0 }
 0x22e   :  { %5882 = vmatpush3.bf16.msra.mxu1 %v6730_v5 }
 0x22f   :  { %6027 = vmatprep.subr.bf16.mxu1 %v7689_v0 }
 0x231   :  { %4849 = vmatmul.mubr.f32.vlgmr.msra.gmra.mrb[2].mxu1 %v6884_v33  ;;  %v1381_v33 = vand.u32 4294901760, %v1343_v3 }
 0x232   :  { %5077 = vmatprep.mubr.msk.f32.mxu1 %vm6463_vm0, %v7681_v4  ;;  %v7055_v4 = vsub.f32 %v1339_v6, %v1369_v32  ;;  %v1350_v6 = vld [vmem:[%s7677_s2 + $0x78] sm:$0xff]  ;;  %v7081_v32 = vsub.f32 %v1345_v50, %v1387_v51  ;;  %v7696_v50 = vand.u32 4294901760, %v6924_v10 }
 0x233   :  { %v7041_v45 = vpack.c.bf16 %v1384_v44, %v1381_v33  ;;  %v7072_v25 = vsub.f32 %v1343_v3, %v1381_v33  ;;  %v1402_v48 = vand.u32 4294901760, %v1350_v6  ;;  %v7089_v3 = vpack.c.bf16 %v1396_v23, %v1393_v24 }
 0x234   :  { %v1451_v34 = vsub.f32 %v6924_v10, %v7696_v50  ;;  %v1458_v23 = vsub.f32 %v6926_v18, %v7695_v53  ;;  %v7703_v53 = vand.u32 4294901760, %v7055_v4  ;;  %v7706_v50 = vand.u32 4294901760, %v7057_v8 }
 0x235   :  { %5897 = vmatpush3.bf16.msra.mxu0 %v7041_v45  ;;  %v7095_v44 = vsub.f32 %v1350_v6, %v1402_v48  ;;  %v7717_v22 = vand.u32 4294901760, %v7081_v32 }
 0x236   :  { %5898 = vmatprep.subr.bf16.mxu0 %v7689_v0  ;;  %v1349_v0 = vld [vmem:[%s7677_s2 + $0x70] sm:$0xff]  ;;  %v1459_v24 = vand.u32 4294901760, %v1458_v23 }
 0x237   :  { %v1399_v41 = vand.u32 4294901760, %v1349_v0 }
 0x239   :  { %5900 = vmatpush3.bf16.msra.mxu0 %v7079_v11  ;;  %v7093_v33 = vsub.f32 %v1349_v0, %v1399_v41  ;;  %v7100_v51 = vpack.c.bf16 %v1402_v48, %v1399_v41  ;;  %v1452_v0 = vand.u32 4294901760, %v1451_v34  ;;  %v1465_v41 = vsub.f32 %v7051_v54, %v7699_v28 }
 0x23a   :  { %5901 = vmatprep.subr.bf16.mxu0 %v7767_v61  ;;  %v1472_v48 = vsub.f32 %v7053_v55, %v7702_v52  ;;  %v7707_v52 = vand.u32 4294901760, %v7068_v29 }
 0x23b   :  { %v7112_v6 = vpack.c.bf16 %v1459_v24, %v1452_v0  ;;  %v1466_v34 = vand.u32 4294901760, %v1465_v41  ;;  %v1479_v0 = vsub.f32 %v7055_v4, %v7703_v53  ;;  %v1486_v24 = vsub.f32 %v7057_v8, %v7706_v50 }
 0x23c   :  { %v1473_v23 = vand.u32 4294901760, %v1472_v48  ;;  %v7712_v41 = vand.u32 4294901760, %v7070_v2  ;;  %v7713_v50 = vand.u32 4294901760, %v7072_v25  ;;  %v7724_v17 = vand.u32 4294901760, %v7093_v33 }
 0x23d   :  { %5903 = vmatpush3.bf16.msra.mxu0 %v7089_v3  ;;  %v1480_v28 = vand.u32 4294901760, %v1479_v0  ;;  %v1487_v57 = vand.u32 4294901760, %v1486_v24  ;;  %v7716_v0 = vand.u32 4294901760, %v7074_v27 }
 0x23e   :  { %5904 = vmatprep.subr.bf16.mxu0 %v7767_v61  ;;  %v7123_v7 = vpack.c.bf16 %v1473_v23, %v1466_v34  ;;  %v1493_v34 = vsub.f32 %v7068_v29, %v7707_v52  ;;  %v1500_v23 = vsub.f32 %v7070_v2, %v7712_v41  ;;  %v1521_v41 = vsub.f32 %v7081_v32, %v7717_v22 }
 0x23f   :  { %v7133_v48 = vpack.c.bf16 %v1487_v57, %v1480_v28  ;;  %v1507_v57 = vsub.f32 %v7072_v25, %v7713_v50  ;;  %v1514_v28 = vsub.f32 %v7074_v27, %v7716_v0  ;;  %v1535_v0 = vsub.f32 %v7086_v37, %v7721_v21 }
 0x240   :  { %v1494_v53 = vand.u32 4294901760, %v1493_v34  ;;  %v1501_v31 = vand.u32 4294901760, %v1500_v23  ;;  %v7720_v34 = vand.u32 4294901760, %v7083_v36 }
 0x241   :  { %5906 = vmatpush3.bf16.msra.mxu0 %v7100_v51  ;;  %v1508_v52 = vand.u32 4294901760, %v1507_v57  ;;  %v1515_v26 = vand.u32 4294901760, %v1514_v28  ;;  %v7726_v57 = vand.u32 4294901760, %v7091_v30 }
 0x242   :  { %5907 = vmatprep.subr.bf16.mxu0 %v7767_v61  ;;  %v5917_v24 = vpack.c.bf16 %v1501_v31, %v1494_v53  ;;  %v1528_v31 = vsub.f32 %v7083_v36, %v7720_v34  ;;  %v1522_v53 = vand.u32 4294901760, %v1521_v41  ;;  %v7725_v41 = vand.u32 4294901760, %v7095_v44 }
 0x243   :  { %v5920_v23 = vpack.c.bf16 %v1515_v26, %v1508_v52  ;;  %v1542_v26 = vsub.f32 %v7091_v30, %v7726_v57  ;;  %v1536_v52 = vand.u32 4294901760, %v1535_v0  ;;  %v1549_v34 = vsub.f32 %v7093_v33, %v7724_v17 }
 0x244   :  { %v1529_v50 = vand.u32 4294901760, %v1528_v31  ;;  %v5932_v0 = vpack.c.bf16 %v6926_v18, %v6924_v10  ;;  %v5944_v17 = vpack.c.bf16 %v7074_v27, %v7072_v25 }
 0x245   :  { %v1543_v22 = vand.u32 4294901760, %v1542_v26  ;;  %v5935_v26 = vpack.c.bf16 %v7053_v55, %v7051_v54 }
 0x246   :  { %v5923_v28 = vpack.c.bf16 %v1529_v50, %v1522_v53  ;;  %v1556_v50 = vsub.f32 %v7095_v44, %v7725_v41  ;;  %v1550_v53 = vand.u32 4294901760, %v1549_v34  ;;  %v5947_v34 = vpack.c.bf16 %v7083_v36, %v7081_v32 }
 0x247   :  { %v5926_v31 = vpack.c.bf16 %v1543_v22, %v1536_v52  ;;  %v5938_v22 = vpack.c.bf16 %v7057_v8, %v7055_v4  ;;  %v5941_v52 = vpack.c.bf16 %v7070_v2, %v7068_v29 }
 0x248   :  { %v1557_v21 = vand.u32 4294901760, %v1556_v50  ;;  %v5953_v50 = vpack.c.bf16 %v7095_v44, %v7093_v33 }
 0x24a   :  { %v5929_v16 = vpack.c.bf16 %v1557_v21, %v1550_v53  ;;  %v5950_v21 = vpack.c.bf16 %v7091_v30, %v7086_v37 }
 0x304   :  { %v1317_v53 = vpop.f32.mrb[2].mxu1 }
 0x305   :  { %v6388_v41 = vadd.f32 1e-05, %v1317_v53  ;;  %v4850_v57 = vpop.f32.mrb[3].mxu1 }
 0x307   :  { %6453 = vrsqrt.f32 %v6388_v41 }
 0x311   :  { %v6454_v15 = vpop.eup %6453 }
 0x312   :  { %v1322_v40 = vmul.f32 %v6454_v15, %v6880_v12  ;;  %v7774_v15 = vand.u32 4294901760, %v7057_v8  ;;  %v7776_v12 = vand.u32 4294901760, %v7070_v2  ;;  %v7780_v8 = vand.u32 4294901760, %v7083_v36 }
 0x313   :  { %v7782_v2 = vand.u32 4294901760, %v7091_v30  ;;  %v2008_v30 = vld [vmem:[%s7679_s3 + $0x28] sm:$0xff] }
 0x314   :  { %v1328_v56 = vmul.f32 %v3861_v42, %v1322_v40  ;;  %v7773_v42 = vand.u32 4294901760, %v7055_v4  ;;  %v7779_v4 = vand.u32 4294901760, %v7081_v32 }
 0x316   :  { %v1334_v19 = vadd.f32 %v3862_v35, %v1328_v56  ;;  %v7771_v56 = vand.u32 4294901760, %v7051_v54  ;;  %v7772_v35 = vand.u32 4294901760, %v7053_v55  ;;  %v7778_v54 = vand.u32 4294901760, %v7074_v27 }
 0x317   :  { %v7784_v27 = vand.u32 4294901760, %v7095_v44  ;;  %v2036_v44 = vand.u32 4294901760, %v2008_v30 }
 0x318   :  { %v7196_v59 = vand.u32 4294901760, %v1334_v19  ;;  %v5983_v40 = vpack.c.bf16 %v7772_v35, %v7771_v56 }
 0x31a   :  { %v1438_v43 = vsub.f32 %v1334_v19, %v7196_v59  ;;  %v7770_v19 = vand.u32 4294901760, %v6926_v18  ;;  %v7777_v18 = vand.u32 4294901760, %v7072_v25  ;;  %v7783_v25 = vand.u32 4294901760, %v7093_v33 }
 0x31c   :  { %v1439_v53 = vand.u32 4294901760, %v1438_v43  ;;  %v5992_v55 = vpack.c.bf16 %v7778_v54, %v7777_v18 }
 0x31e   :  { %v1440_v57 = vsub.f32 %v1438_v43, %v1439_v53 }
 0x320   :  { %v1441_v41 = vand.u32 4294901760, %v1440_v57 }
 0x322   :  { %4884 = vmatmul.mubr.f32.vlgmr.msra.gmra.mrb[2].mxu0 %v1441_v41 }
 0x323   :  { %5909 = vmatpush3.bf16.msra.mxu0 %v7112_v6  ;;  %4918 = vmatprep.mubr.msk.f32.mxu0 %vm6463_vm0, %v7768_v9  ;;  %v5995_v6 = vpack.c.bf16 %v7780_v8, %v7779_v4 }
 0x324   :  { %5910 = vmatprep.subr.bf16.mxu0 %v7767_v61 }
 0x327   :  { %5912 = vmatpush3.bf16.msra.mxu0 %v7123_v7 }
 0x328   :  { %5913 = vmatprep.subr.bf16.mxu0 %v7767_v61 }
 0x32b   :  { %5915 = vmatpush3.bf16.msra.mxu0 %v7133_v48 }
 0x32c   :  { %5916 = vmatprep.subr.bf16.mxu0 %v7767_v61 }
 0x32f   :  { %5918 = vmatpush3.bf16.msra.mxu0 %v5917_v24  ;;  %v6001_v24 = vpack.c.bf16 %v7784_v27, %v7783_v25 }
 0x330   :  { %5919 = vmatprep.subr.bf16.mxu0 %v7767_v61 }
 0x333   :  { %5921 = vmatpush3.bf16.msra.mxu0 %v5920_v23 }
 0x334   :  { %5922 = vmatprep.subr.bf16.mxu0 %v7767_v61 }
 0x337   :  { %5924 = vmatpush3.bf16.msra.mxu0 %v5923_v28 }
 0x338   :  { %5925 = vmatprep.subr.bf16.mxu0 %v7767_v61 }
 0x33b   :  { %5927 = vmatpush3.bf16.msra.mxu0 %v5926_v31  ;;  %v2009_v31 = vld [vmem:[%s7679_s3 + $0x30] sm:$0xff] }
 0x33c   :  { %5928 = vmatprep.subr.bf16.mxu0 %v7767_v61 }
 0x33f   :  { %5930 = vmatpush3.bf16.msra.mxu0 %v5929_v16  ;;  %v5986_v16 = vpack.c.bf16 %v7774_v15, %v7773_v42 }
 0x340   :  { %5931 = vmatprep.subr.bf16.mxu0 %v7767_v61 }
 0x342   :  { %4919 = vmatmul.mubr.f32.vlgmr.msra.gmra.mrb[2].mxu0 %v7196_v59 }
 0x343   :  { %5933 = vmatpush3.bf16.msra.mxu0 %v5932_v0  ;;  %4953 = vmatprep.mubr.msk.f32.mxu0 %vm6463_vm0, %v7768_v9  ;;  %v2010_v0 = vld [vmem:[%s7679_s3 + $0x38] sm:$0xff] }
 0x344   :  { %5934 = vmatprep.subr.bf16.mxu0 %v7767_v61 }
 0x347   :  { %5936 = vmatpush3.bf16.msra.mxu0 %v5935_v26 }
 0x348   :  { %5937 = vmatprep.subr.bf16.mxu0 %v7767_v61 }
 0x34b   :  { %5939 = vmatpush3.bf16.msra.mxu0 %v5938_v22 }
 0x34c   :  { %5940 = vmatprep.subr.bf16.mxu0 %v7767_v61 }
 0x34f   :  { %5942 = vmatpush3.bf16.msra.mxu0 %v5941_v52 }
 0x350   :  { %5943 = vmatprep.subr.bf16.mxu0 %v7767_v61 }
 0x353   :  { %5945 = vmatpush3.bf16.msra.mxu0 %v5944_v17  ;;  %v7775_v17 = vand.u32 4294901760, %v7068_v29  ;;  %v7781_v29 = vand.u32 4294901760, %v7086_v37 }
 0x354   :  { %5946 = vmatprep.subr.bf16.mxu0 %v7767_v61 }
 0x355   :  { %v5998_v48 = vpack.c.bf16 %v7782_v2, %v7781_v29 }
 0x357   :  { %5948 = vmatpush3.bf16.msra.mxu0 %v5947_v34  ;;  %v7366_v34 = vsub.f32 %v2008_v30, %v2036_v44 }
 0x358   :  { %5949 = vmatprep.subr.bf16.mxu0 %v7767_v61 }
 0x35b   :  { %5951 = vmatpush3.bf16.msra.mxu0 %v5950_v21  ;;  %v2039_v21 = vand.u32 4294901760, %v2009_v31 }
 0x35c   :  { %5952 = vmatprep.subr.bf16.mxu0 %v7767_v61 }
 0x35f   :  { %5954 = vmatpush3.bf16.msra.mxu0 %v5953_v50  ;;  %v2042_v50 = vand.u32 4294901760, %v2010_v0 }
 0x360   :  { %5955 = vmatprep.subr.bf16.mxu0 %v7767_v61 }
 0x361   :  { %v7371_v41 = vpack.c.bf16 %v2042_v50, %v2039_v21 }
 0x362   :  { %4954 = vmatmul.mubr.f32.vlgmr.msra.gmra.mrb[2].mxu0 %v1438_v43  ;;  %v7769_v43 = vand.u32 4294901760, %v6924_v10  ;;  %v5989_v10 = vpack.c.bf16 %v7776_v12, %v7775_v17 }
 0x363   :  { %5957 = vmatpush3.bf16.msra.mxu0 %v6922_v58  ;;  %4988 = vmatprep.mubr.msk.f32.mxu0 %vm6463_vm0, %v7768_v9 }
 0x364   :  { %5958 = vmatprep.subr.bf16.mxu0 %v7767_v61  ;;  %v5980_v7 = vpack.c.bf16 %v7770_v19, %v7769_v43  ;;  %v7373_v43 = vsub.f32 %v2009_v31, %v2039_v21  ;;  %v7375_v19 = vsub.f32 %v2010_v0, %v2042_v50  ;;  %v3863_v31 = vld [vmem:[%s7678_s4] ss:$0 sm:$0xff] }
 0x366   :  { %v2155_v25 = vand.u32 4294901760, %v7375_v19 }
 0x367   :  { %5960 = vmatpush3.bf16.msra.mxu0 %v7011_v47 }
 0x368   :  { %5961 = vmatprep.subr.bf16.mxu0 %v7767_v61 }
 0x36b   :  { %5963 = vmatpush3.bf16.msra.mxu0 %v7021_v38 }
 0x36c   :  { %5964 = vmatprep.subr.bf16.mxu0 %v7767_v61 }
 0x36f   :  { %5966 = vmatpush3.bf16.msra.mxu0 %v7031_v62 }
 0x370   :  { %5967 = vmatprep.subr.bf16.mxu0 %v7767_v61 }
 0x373   :  { %5969 = vmatpush3.bf16.msra.mxu0 %v7041_v45 }
 0x374   :  { %5970 = vmatprep.subr.bf16.mxu0 %v7767_v61 }
 0x377   :  { %5972 = vmatpush3.bf16.msra.mxu0 %v7079_v11 }
 0x378   :  { %5973 = vmatprep.subr.bf16.mxu0 %v7767_v61 }
 0x37b   :  { %5975 = vmatpush3.bf16.msra.mxu0 %v7089_v3 }
 0x37c   :  { %5976 = vmatprep.subr.bf16.mxu0 %v7767_v61 }
 0x37f   :  { %5978 = vmatpush3.bf16.msra.mxu0 %v7100_v51 }
 0x380   :  { %5979 = vmatprep.subr.bf16.mxu0 %v7767_v61 }
 0x382   :  { %4989 = vmatmul.mubr.f32.vlgmr.msra.gmra.mrb[2].mxu0 %v1439_v53 }
 0x383   :  { %5981 = vmatpush3.bf16.msra.mxu0 %v5980_v7  ;;  %5023 = vmatprep.mubr.msk.f32.mxu0 %vm6463_vm0, %v7768_v9 }
 0x384   :  { %5982 = vmatprep.subr.bf16.mxu0 %v7767_v61 }
 0x387   :  { %5984 = vmatpush3.bf16.msra.mxu0 %v5983_v40 }
 0x388   :  { %5985 = vmatprep.subr.bf16.mxu0 %v7767_v61 }
 0x38b   :  { %5987 = vmatpush3.bf16.msra.mxu0 %v5986_v16 }
 0x38c   :  { %5988 = vmatprep.subr.bf16.mxu0 %v7767_v61 }
 0x38f   :  { %5990 = vmatpush3.bf16.msra.mxu0 %v5989_v10 }
 0x390   :  { %5991 = vmatprep.subr.bf16.mxu0 %v7767_v61 }
 0x393   :  { %5993 = vmatpush3.bf16.msra.mxu0 %v5992_v55  ;;  %v2141_v55 = vand.u32 4294901760, %v7366_v34 }
 0x394   :  { %5994 = vmatprep.subr.bf16.mxu0 %v7767_v61 }
 0x397   :  { %5996 = vmatpush3.bf16.msra.mxu0 %v5995_v6  ;;  %v2142_v6 = vsub.f32 %v7366_v34, %v2141_v55 }
 0x398   :  { %5997 = vmatprep.subr.bf16.mxu0 %v7767_v61 }
 0x399   :  { %v2143_v2 = vand.u32 4294901760, %v2142_v6  ;;  %v7793_v6 = vld [vmem:[#allocation18_spill] sm:$0xff] }
 0x39b   :  { %5999 = vmatpush3.bf16.msra.mxu0 %v5998_v48  ;;  %v2148_v48 = vand.u32 4294901760, %v7373_v43 }
 0x39c   :  { %6000 = vmatprep.subr.bf16.mxu0 %v7767_v61 }
 0x39f   :  { %6002 = vmatpush3.bf16.msra.mxu0 %v6001_v24  ;;  %v2149_v24 = vsub.f32 %v7373_v43, %v2148_v48 }
 0x3a0   :  { %6003 = vmatprep.subr.bf16.mxu0 %v7767_v61 }
 0x3a2   :  { %5024 = vmatmul.mubr.f32.vlgmr.msra.gmra.mrb[2].mxu0 %v7196_v59 }
 0x3a3   :  { %6005 = vmatpush3.bf16.msra.mxu0 %v6922_v58  ;;  %5058 = vmatprep.mubr.msk.f32.mxu0 %vm6463_vm0, %v7768_v9  ;;  %v2004_v58 = vld [vmem:[%s7679_s3 + $0x8] sm:$0xff] }
 0x3a4   :  { %6006 = vmatprep.subr.bf16.mxu0 %v7767_v61 }
 0x3a7   :  { %6008 = vmatpush3.bf16.msra.mxu0 %v7011_v47 }
 0x3a8   :  { %6009 = vmatprep.subr.bf16.mxu0 %v7767_v61 }
 0x3ab   :  { %6011 = vmatpush3.bf16.msra.mxu0 %v7021_v38  ;;  %v2024_v38 = vand.u32 4294901760, %v2004_v58 }
 0x3ac   :  { %6012 = vmatprep.subr.bf16.mxu0 %v7767_v61 }
 0x3ad   :  { %v7349_v23 = vsub.f32 %v2004_v58, %v2024_v38  ;;  %v2150_v58 = vand.u32 4294901760, %v2149_v24  ;;  %v7799_v24 = vld [vmem:[#allocation6_spill] sm:$0xff] }
 0x3af   :  { %6014 = vmatpush3.bf16.msra.mxu0 %v7031_v62  ;;  %v2113_v57 = vand.u32 4294901760, %v7349_v23 }
 0x3b0   :  { %6015 = vmatprep.subr.bf16.mxu0 %v7767_v61 }
 0x3b1   :  { %v2114_v56 = vsub.f32 %v7349_v23, %v2113_v57 }
 0x3b3   :  { %6017 = vmatpush3.bf16.msra.mxu0 %v7041_v45  ;;  %v2005_v45 = vld [vmem:[%s7679_s3 + $0x10] sm:$0xff]  ;;  %v2115_v15 = vand.u32 4294901760, %v2114_v56 }
 0x3b4   :  { %6018 = vmatprep.subr.bf16.mxu0 %v7767_v61  ;;  %v2027_v32 = vand.u32 4294901760, %v2005_v45 }
 0x3b6   :  { %v7359_v26 = vsub.f32 %v2005_v45, %v2027_v32 }
 0x3b7   :  { %6020 = vmatpush3.bf16.msra.mxu0 %v7079_v11  ;;  %v2006_v11 = vld [vmem:[%s7679_s3 + $0x18] sm:$0xff] }
 0x3b8   :  { %6021 = vmatprep.subr.bf16.mxu0 %v7767_v61  ;;  %v2030_v36 = vand.u32 4294901760, %v2006_v11  ;;  %v2120_v40 = vand.u32 4294901760, %v7359_v26 }
 0x3ba   :  { %v7337_v37 = vpack.c.bf16 %v2030_v36, %v2027_v32  ;;  %v7361_v22 = vsub.f32 %v2006_v11, %v2030_v36  ;;  %v2121_v16 = vsub.f32 %v7359_v26, %v2120_v40  ;;  %v6061_v36 = vpack.c.bf16 %v7375_v19, %v7373_v43 }
 0x3bb   :  { %6023 = vmatpush3.bf16.msra.mxu0 %v7089_v3  ;;  %v2007_v3 = vld [vmem:[%s7679_s3 + $0x20] sm:$0xff] }
 0x3bc   :  { %6024 = vmatprep.subr.bf16.mxu0 %v7767_v61  ;;  %v2033_v33 = vand.u32 4294901760, %v2007_v3  ;;  %v2127_v42 = vand.u32 4294901760, %v7361_v22  ;;  %v2122_v10 = vand.u32 4294901760, %v2121_v16  ;;  %v6055_v11 = vpack.c.bf16 %v7361_v22, %v7359_v26 }
 0x3be   :  { %v7351_v28 = vpack.c.bf16 %v2036_v44, %v2033_v33  ;;  %v7364_v52 = vsub.f32 %v2007_v3, %v2033_v33  ;;  %v2128_v17 = vsub.f32 %v7361_v22, %v2127_v42  ;;  %v6079_v30 = vpack.c.bf16 %v2127_v42, %v2120_v40 }
 0x3bf   :  { %6026 = vmatpush3.bf16.msra.mxu0 %v7100_v51  ;;  %v6085_v44 = vpack.c.bf16 %v2155_v25, %v2148_v48  ;;  %v7796_v48 = vld [vmem:[#allocation21_spill] sm:$0xff] }
 0x3c0   :  { %6243 = vmatprep.subr.bf16.mxu0 %v7767_v61  ;;  %v2129_v18 = vand.u32 4294901760, %v2128_v17  ;;  %v2134_v54 = vand.u32 4294901760, %v7364_v52  ;;  %v6058_v32 = vpack.c.bf16 %v7366_v34, %v7364_v52  ;;  %v7785_v17 = vld [vmem:[#allocation2_spill] sm:$0xff] }
 0x3c2   :  { %5059 = vmatmul.mubr.f32.vlgmr.msra.gmra.mrb[2].mxu0 %v7196_v59  ;;  %v2003_v59 = vld [vmem:[%s7679_s3] sm:$0xff]  ;;  %v6043_v4 = vpack.c.bf16 %v2129_v18, %v2122_v10  ;;  %v2135_v8 = vsub.f32 %v7364_v52, %v2134_v54  ;;  %v6082_v33 = vpack.c.bf16 %v2141_v55, %v2134_v54  ;;  %v7787_v10 = vld [vmem:[#allocation4_spill] sm:$0xff]  ;;  %v7788_v18 = vld [vmem:[#allocation5_spill] sm:$0xff] }
 0x3c3   :  { %6245 = vmatpush3.bf16.msra.mxu0 %v6519_v14  ;;  %5417 = vmatprep.mubr.msk.f32.mxu0 %vm6463_vm0, %v7768_v9  ;;  %v2021_v47 = vand.u32 4294901760, %v2003_v59  ;;  %v7789_v54 = vld [vmem:[#allocation14_spill] sm:$0xff]  ;;  %v7790_v55 = vld [vmem:[#allocation15_spill] sm:$0xff] }
 0x3c4   :  { %6246 = vmatprep.subr.bf16.mxu0 %v7767_v61  ;;  %v2136_v29 = vand.u32 4294901760, %v2135_v8  ;;  %v7792_v8 = vld [vmem:[#allocation17_spill] sm:$0xff] }
 0x3c5   :  { %v7327_v62 = vpack.c.bf16 %v2024_v38, %v2021_v47  ;;  %v7347_v51 = vsub.f32 %v2003_v59, %v2021_v47  ;;  %v2156_v59 = vsub.f32 %v7375_v19, %v2155_v25  ;;  %v7797_v25 = vld [vmem:[#allocation22_spill] sm:$0xff] }
 0x3c6   :  { %v6046_v27 = vpack.c.bf16 %v2143_v2, %v2136_v29  ;;  %v7794_v29 = vld [vmem:[#allocation19_spill] sm:$0xff]  ;;  %v7795_v2 = vld [vmem:[#allocation20_spill] sm:$0xff] }
 0x3c7   :  { %6248 = vmatpush3.bf16.msra.mxu0 %v6533_v20  ;;  %6029 = vmatpush3.bf16.msra.mxu1 %v7327_v62  ;;  %v2106_v53 = vand.u32 4294901760, %v7347_v51  ;;  %v2157_v47 = vand.u32 4294901760, %v2156_v59  ;;  %v6052_v45 = vpack.c.bf16 %v7349_v23, %v7347_v51  ;;  %v7800_v59 = vld [vmem:[#allocation7_spill] sm:$0xff] }
 0x3c8   :  { %6249 = vmatprep.subr.bf16.mxu0 %v7767_v61  ;;  %6030 = vmatprep.subr.bf16.mxu1 %v7767_v61 }
 0x3c9   :  { %v2107_v7 = vsub.f32 %v7347_v51, %v2106_v53  ;;  %v6049_v38 = vpack.c.bf16 %v2157_v47, %v2150_v58  ;;  %v6076_v3 = vpack.c.bf16 %v2113_v57, %v2106_v53  ;;  %v7801_v58 = vld [vmem:[#allocation8_spill] sm:$0xff]  ;;  %v7802_v47 = vld [vmem:[#allocation9_spill] sm:$0xff] }
 0x3cb   :  { %6251 = vmatpush3.bf16.msra.mxu0 %v6581_v46  ;;  %6032 = vmatpush3.bf16.msra.mxu1 %v7337_v37  ;;  %v2108_v35 = vand.u32 4294901760, %v2107_v7 }
 0x3cc   :  { %6252 = vmatprep.subr.bf16.mxu0 %v7767_v61  ;;  %6033 = vmatprep.subr.bf16.mxu1 %v7767_v61 }
 0x3cd   :  { %v6040_v12 = vpack.c.bf16 %v2115_v15, %v2108_v35 }
 0x3cf   :  { %6254 = vmatpush3.bf16.msra.mxu0 %v6611_v63  ;;  %6035 = vmatpush3.bf16.msra.mxu1 %v7351_v28 }
 0x3d0   :  { %6255 = vmatprep.subr.bf16.mxu0 %v7767_v61  ;;  %6036 = vmatprep.subr.bf16.mxu1 %v7767_v61 }
 0x3d3   :  { %6257 = vmatpush3.bf16.msra.mxu0 %v6650_v39  ;;  %6038 = vmatpush3.bf16.msra.mxu1 %v7371_v41 }
 0x3d4   :  { %6258 = vmatprep.subr.bf16.mxu0 %v7767_v61  ;;  %6039 = vmatprep.subr.bf16.mxu1 %v7767_v61 }
 0x3d7   :  { %6260 = vmatpush3.bf16.msra.mxu0 %v6671_v1 }
 0x3d8   :  { %6261 = vmatprep.subr.bf16.mxu0 %v7767_v61 }
 0x3db   :  { %6263 = vmatpush3.bf16.msra.mxu0 %v6675_v13 }
 0x3dc   :  { %6264 = vmatprep.subr.bf16.mxu0 %v7767_v61 }
 0x3df   :  { %6266 = vmatpush3.bf16.msra.mxu0 %v6730_v5 }
 0x3e0   :  { %6267 = vmatprep.subr.bf16.mxu0 %v7767_v61 }
 0x495   :  { %v1993_v0 = vpop.f32.mrb[2].mxu0 }
 0x496   :  { %v6389_v21 = vadd.f32 %v3863_v31, %v1993_v0  ;;  %v5060_v51 = vpop.f32.mrb[3].mxu0 }
 0x498   :  { %v1997_v23 = vsub.f32 0.0, %v6389_v21 }
 0x49a   :  { %v1998_v50 = vmul.f32 1.442695, %v1997_v23 }
 0x49c   :  { %6455 = vpow2.f32 %v1998_v50 }
 0x4a6   :  { %v6456_v26 = vpop.eup %6455 }
 0x4a7   :  { %v2000_v22 = vadd.f32 1.0, %v6456_v26 }
 0x4a9   :  { %6457 = vrcp.f32 %v2000_v22 }
 0x4b3   :  { %v6458_v52 = vpop.eup %6457 }
 0x4b4   :  { %v2002_v34 = vmul.f32 %v6458_v52, %v6389_v21 }
 0x4b6   :  { %v2018_v53 = vsel %vm2016_vm1, %v2002_v34, 0 }
 0x4b7   :  { %v2093_v57 = vand.u32 4294901760, %v2018_v53 }
 0x4b9   :  { %v2094_v43 = vsub.f32 %v2018_v53, %v2093_v57 }
 0x4bb   :  { %v2095_v19 = vand.u32 4294901760, %v2094_v43 }
 0x4bd   :  { %v2096_v7 = vsub.f32 %v2094_v43, %v2095_v19 }
 0x4bf   :  { %v2097_v56 = vand.u32 4294901760, %v2096_v7 }
 0x4c1   :  { %5078 = vmatmul.mubr.f32.vlgmr.msra.gmra.mrb[4].mxu1 %v2097_v56 }
 0x4c2   :  { %6041 = vmatpush3.bf16.msra.mxu1 %v6040_v12  ;;  %5096 = vmatprep.mubr.msk.f32.mxu1 %vm6463_vm0, %v7768_v9  ;;  %v7786_v12 = vld [vmem:[#allocation3_spill] sm:$0xff] }
 0x4c3   :  { %6042 = vmatprep.subr.bf16.mxu1 %v7767_v61 }
 0x4c6   :  { %6044 = vmatpush3.bf16.msra.mxu1 %v6043_v4  ;;  %v7791_v4 = vld [vmem:[#allocation16_spill] sm:$0xff] }
 0x4c7   :  { %6045 = vmatprep.subr.bf16.mxu1 %v7767_v61 }
 0x4ca   :  { %6047 = vmatpush3.bf16.msra.mxu1 %v6046_v27  ;;  %v7798_v27 = vld [vmem:[#allocation23_spill] sm:$0xff] }
 0x4cb   :  { %6048 = vmatprep.subr.bf16.mxu1 %v7767_v61 }
 0x4ce   :  { %6050 = vmatpush3.bf16.msra.mxu1 %v6049_v38  ;;  %v7803_v38 = vld [vmem:[#allocation10_spill] sm:$0xff] }
 0x4cf   :  { %6051 = vmatprep.subr.bf16.mxu1 %v7767_v61 }
 0x4d1   :  { %5097 = vmatmul.mubr.f32.vlgmr.msra.gmra.mrb[4].mxu1 %v2093_v57 }
 0x4d2   :  { %6053 = vmatpush3.bf16.msra.mxu1 %v6052_v45  ;;  %5115 = vmatprep.mubr.msk.f32.mxu1 %vm6463_vm0, %v7768_v9  ;;  %v7804_v45 = vld [vmem:[#allocation11_spill] sm:$0xff] }
 0x4d3   :  { %6054 = vmatprep.subr.bf16.mxu1 %v7767_v61 }
 0x4d6   :  { %6056 = vmatpush3.bf16.msra.mxu1 %v6055_v11  ;;  %v7805_v11 = vld [vmem:[#allocation12_spill] sm:$0xff] }
 0x4d7   :  { %6057 = vmatprep.subr.bf16.mxu1 %v7767_v61 }
 0x4da   :  { %6059 = vmatpush3.bf16.msra.mxu1 %v6058_v32  ;;  %v7806_v32 = vld [vmem:[#allocation13_spill] sm:$0xff] }
 0x4db   :  { %6060 = vmatprep.subr.bf16.mxu1 %v7767_v61 }
 0x4de   :  { %6062 = vmatpush3.bf16.msra.mxu1 %v6061_v36 }
 0x4df   :  { %6063 = vmatprep.subr.bf16.mxu1 %v7767_v61 }
 0x4e1   :  { %5116 = vmatmul.mubr.f32.vlgmr.msra.gmra.mrb[4].mxu1 %v2094_v43 }
 0x4e2   :  { %6065 = vmatpush3.bf16.msra.mxu1 %v7327_v62  ;;  %5134 = vmatprep.mubr.msk.f32.mxu1 %vm6463_vm0, %v7768_v9 }
 0x4e3   :  { %6066 = vmatprep.subr.bf16.mxu1 %v7767_v61 }
 0x4e6   :  { %6068 = vmatpush3.bf16.msra.mxu1 %v7337_v37 }
 0x4e7   :  { %6069 = vmatprep.subr.bf16.mxu1 %v7767_v61 }
 0x4ea   :  { %6071 = vmatpush3.bf16.msra.mxu1 %v7351_v28 }
 0x4eb   :  { %6072 = vmatprep.subr.bf16.mxu1 %v7767_v61 }
 0x4ee   :  { %6074 = vmatpush3.bf16.msra.mxu1 %v7371_v41 }
 0x4ef   :  { %6075 = vmatprep.subr.bf16.mxu1 %v7767_v61 }
 0x4f1   :  { %5135 = vmatmul.mubr.f32.vlgmr.msra.gmra.mrb[4].mxu1 %v2095_v19 }
 0x4f2   :  { %6077 = vmatpush3.bf16.msra.mxu1 %v6076_v3  ;;  %5153 = vmatprep.mubr.msk.f32.mxu1 %vm6463_vm0, %v7768_v9 }
 0x4f3   :  { %6078 = vmatprep.subr.bf16.mxu1 %v7767_v61 }
 0x4f6   :  { %6080 = vmatpush3.bf16.msra.mxu1 %v6079_v30 }
 0x4f7   :  { %6081 = vmatprep.subr.bf16.mxu1 %v7767_v61 }
 0x4fa   :  { %6083 = vmatpush3.bf16.msra.mxu1 %v6082_v33 }
 0x4fb   :  { %6084 = vmatprep.subr.bf16.mxu1 %v7767_v61 }
 0x4fe   :  { %6086 = vmatpush3.bf16.msra.mxu1 %v6085_v44 }
 0x4ff   :  { %6087 = vmatprep.subr.bf16.mxu1 %v7767_v61 }
 0x501   :  { %5154 = vmatmul.mubr.f32.vlgmr.msra.gmra.mrb[4].mxu1 %v2093_v57 }
 0x502   :  { %6089 = vmatpush3.bf16.msra.mxu1 %v7327_v62  ;;  %5172 = vmatprep.mubr.msk.f32.mxu1 %vm6463_vm0, %v7768_v9  ;;  %v3864_v62 = vld [vmem:[%s7678_s4 + $0x1] ss:$0 sm:$0xff] }
 0x503   :  { %6090 = vmatprep.subr.bf16.mxu1 %v7767_v61 }
 0x506   :  { %6092 = vmatpush3.bf16.msra.mxu1 %v7337_v37 }
 0x507   :  { %6093 = vmatprep.subr.bf16.mxu1 %v7767_v61 }
 0x50a   :  { %6095 = vmatpush3.bf16.msra.mxu1 %v7351_v28 }
 0x50b   :  { %6096 = vmatprep.subr.bf16.mxu1 %v7767_v61 }
 0x50e   :  { %6098 = vmatpush3.bf16.msra.mxu1 %v7371_v41 }
 0x50f   :  { %6099 = vmatprep.subr.bf16.mxu1 %v7767_v61 }
 0x511   :  { %5173 = vmatmul.mubr.f32.vlgmr.msra.gmra.mrb[4].mxu1 %v2093_v57 }
 0x512   :  { %6101 = vmatpush3.bf16.msra.mxu1 %v6519_v14  ;;  %5207 = vmatprep.mubr.msk.f32.mxu1 %vm6463_vm0, %v7768_v9 }
 0x513   :  { %6102 = vmatprep.subr.bf16.mxu1 %v7767_v61 }
 0x516   :  { %6104 = vmatpush3.bf16.msra.mxu1 %v6533_v20 }
 0x517   :  { %6105 = vmatprep.subr.bf16.mxu1 %v7767_v61 }
 0x51a   :  { %6107 = vmatpush3.bf16.msra.mxu1 %v6581_v46 }
 0x51b   :  { %6108 = vmatprep.subr.bf16.mxu1 %v7767_v61 }
 0x51e   :  { %6110 = vmatpush3.bf16.msra.mxu1 %v6611_v63 }
 0x51f   :  { %6111 = vmatprep.subr.bf16.mxu1 %v7767_v61 }
 0x522   :  { %6113 = vmatpush3.bf16.msra.mxu1 %v6650_v39 }
 0x523   :  { %6114 = vmatprep.subr.bf16.mxu1 %v7767_v61 }
 0x526   :  { %6116 = vmatpush3.bf16.msra.mxu1 %v6671_v1 }
 0x527   :  { %6117 = vmatprep.subr.bf16.mxu1 %v7767_v61 }
 0x52a   :  { %6119 = vmatpush3.bf16.msra.mxu1 %v6675_v13 }
 0x52b   :  { %6120 = vmatprep.subr.bf16.mxu1 %v7767_v61 }
 0x52e   :  { %6122 = vmatpush3.bf16.msra.mxu1 %v6730_v5 }
 0x52f   :  { %6123 = vmatprep.subr.bf16.mxu1 %v7767_v61 }
 0x5e4   :  { %v2553_v37 = vpop.f32.mrb[4].mxu1 }
 0x5e5   :  { %v7463_v28 = vadd.f32 %v3864_v62, %v2553_v37  ;;  %v5174_v41 = vpop.f32.mrb[5].mxu1 }
 0x5e7   :  { %v7466_v35 = vand.u32 4294901760, %v7463_v28 }
 0x5e9   :  { %v2639_v40 = vsub.f32 %v7463_v28, %v7466_v35 }
 0x5eb   :  { %v2640_v42 = vand.u32 4294901760, %v2639_v40 }
 0x5ed   :  { %v2641_v15 = vsub.f32 %v2639_v40, %v2640_v42 }
 0x5ef   :  { %v2642_v16 = vand.u32 4294901760, %v2641_v15 }
 0x5f1   :  { %5208 = vmatmul.mubr.f32.vlgmr.msra.gmra.mrb[6].mxu1 %v2642_v16 }
 0x5f2   :  { %6125 = vmatpush3.bf16.msra.mxu1 %v6587_v49  ;;  %5242 = vmatprep.mubr.msk.f32.mxu1 %vm6463_vm0, %v7768_v9 }
 0x5f3   :  { %6126 = vmatprep.subr.bf16.mxu1 %v7767_v61 }
 0x5f6   :  { %6128 = vmatpush3.bf16.msra.mxu1 %v6604_v60 }
 0x5f7   :  { %6129 = vmatprep.subr.bf16.mxu1 %v7767_v61 }
 0x5fa   :  { %6131 = vmatpush3.bf16.msra.mxu1 %v7785_v17 }
 0x5fb   :  { %6132 = vmatprep.subr.bf16.mxu1 %v7767_v61 }
 0x5fe   :  { %6134 = vmatpush3.bf16.msra.mxu1 %v7786_v12 }
 0x5ff   :  { %6135 = vmatprep.subr.bf16.mxu1 %v7767_v61 }
 0x602   :  { %6137 = vmatpush3.bf16.msra.mxu1 %v7787_v10 }
 0x603   :  { %6138 = vmatprep.subr.bf16.mxu1 %v7767_v61 }
 0x606   :  { %6140 = vmatpush3.bf16.msra.mxu1 %v7788_v18 }
 0x607   :  { %6141 = vmatprep.subr.bf16.mxu1 %v7767_v61 }
 0x60a   :  { %6143 = vmatpush3.bf16.msra.mxu1 %v7789_v54 }
 0x60b   :  { %6144 = vmatprep.subr.bf16.mxu1 %v7767_v61 }
 0x60e   :  { %6146 = vmatpush3.bf16.msra.mxu1 %v7790_v55 }
 0x60f   :  { %6147 = vmatprep.subr.bf16.mxu1 %v7767_v61 }
 0x611   :  { %5243 = vmatmul.mubr.f32.vlgmr.msra.gmra.mrb[6].mxu1 %v7466_v35 }
 0x612   :  { %6149 = vmatpush3.bf16.msra.mxu1 %v7791_v4  ;;  %5277 = vmatprep.mubr.msk.f32.mxu1 %vm6463_vm0, %v7768_v9 }
 0x613   :  { %6150 = vmatprep.subr.bf16.mxu1 %v7767_v61 }
 0x616   :  { %6152 = vmatpush3.bf16.msra.mxu1 %v7792_v8 }
 0x617   :  { %6153 = vmatprep.subr.bf16.mxu1 %v7767_v61 }
 0x61a   :  { %6155 = vmatpush3.bf16.msra.mxu1 %v7793_v6 }
 0x61b   :  { %6156 = vmatprep.subr.bf16.mxu1 %v7767_v61 }
 0x61e   :  { %6158 = vmatpush3.bf16.msra.mxu1 %v7794_v29 }
 0x61f   :  { %6159 = vmatprep.subr.bf16.mxu1 %v7767_v61 }
 0x622   :  { %6161 = vmatpush3.bf16.msra.mxu1 %v7795_v2 }
 0x623   :  { %6162 = vmatprep.subr.bf16.mxu1 %v7767_v61 }
 0x626   :  { %6164 = vmatpush3.bf16.msra.mxu1 %v7796_v48 }
 0x627   :  { %6165 = vmatprep.subr.bf16.mxu1 %v7767_v61 }
 0x62a   :  { %6167 = vmatpush3.bf16.msra.mxu1 %v7797_v25 }
 0x62b   :  { %6168 = vmatprep.subr.bf16.mxu1 %v7767_v61 }
 0x62e   :  { %6170 = vmatpush3.bf16.msra.mxu1 %v7798_v27 }
 0x62f   :  { %6171 = vmatprep.subr.bf16.mxu1 %v7767_v61 }
 0x631   :  { %5278 = vmatmul.mubr.f32.vlgmr.msra.gmra.mrb[6].mxu1 %v2639_v40 }
 0x632   :  { %6173 = vmatpush3.bf16.msra.mxu1 %v6519_v14  ;;  %5312 = vmatprep.mubr.msk.f32.mxu1 %vm6463_vm0, %v7768_v9 }
 0x633   :  { %6174 = vmatprep.subr.bf16.mxu1 %v7767_v61 }
 0x636   :  { %6176 = vmatpush3.bf16.msra.mxu1 %v6533_v20 }
 0x637   :  { %6177 = vmatprep.subr.bf16.mxu1 %v7767_v61 }
 0x63a   :  { %6179 = vmatpush3.bf16.msra.mxu1 %v6581_v46 }
 0x63b   :  { %6180 = vmatprep.subr.bf16.mxu1 %v7767_v61 }
 0x63e   :  { %6182 = vmatpush3.bf16.msra.mxu1 %v6611_v63 }
 0x63f   :  { %6183 = vmatprep.subr.bf16.mxu1 %v7767_v61 }
 0x642   :  { %6185 = vmatpush3.bf16.msra.mxu1 %v6650_v39 }
 0x643   :  { %6186 = vmatprep.subr.bf16.mxu1 %v7767_v61 }
 0x646   :  { %6188 = vmatpush3.bf16.msra.mxu1 %v6671_v1 }
 0x647   :  { %6189 = vmatprep.subr.bf16.mxu1 %v7767_v61 }
 0x64a   :  { %6191 = vmatpush3.bf16.msra.mxu1 %v6675_v13 }
 0x64b   :  { %6192 = vmatprep.subr.bf16.mxu1 %v7767_v61 }
 0x64e   :  { %6194 = vmatpush3.bf16.msra.mxu1 %v6730_v5 }
 0x64f   :  { %6195 = vmatprep.subr.bf16.mxu1 %v7767_v61 }
 0x651   :  { %5313 = vmatmul.mubr.f32.vlgmr.msra.gmra.mrb[6].mxu1 %v2640_v42 }
 0x652   :  { %6197 = vmatpush3.bf16.msra.mxu1 %v7799_v24  ;;  %5347 = vmatprep.mubr.msk.f32.mxu1 %vm6463_vm0, %v7768_v9 }
 0x653   :  { %6198 = vmatprep.subr.bf16.mxu1 %v7767_v61 }
 0x656   :  { %6200 = vmatpush3.bf16.msra.mxu1 %v7800_v59 }
 0x657   :  { %6201 = vmatprep.subr.bf16.mxu1 %v7767_v61 }
 0x65a   :  { %6203 = vmatpush3.bf16.msra.mxu1 %v7801_v58 }
 0x65b   :  { %6204 = vmatprep.subr.bf16.mxu1 %v7767_v61 }
 0x65e   :  { %6206 = vmatpush3.bf16.msra.mxu1 %v7802_v47 }
 0x65f   :  { %6207 = vmatprep.subr.bf16.mxu1 %v7767_v61 }
 0x662   :  { %6209 = vmatpush3.bf16.msra.mxu1 %v7803_v38 }
 0x663   :  { %6210 = vmatprep.subr.bf16.mxu1 %v7767_v61 }
 0x666   :  { %6212 = vmatpush3.bf16.msra.mxu1 %v7804_v45 }
 0x667   :  { %6213 = vmatprep.subr.bf16.mxu1 %v7767_v61 }
 0x66a   :  { %6215 = vmatpush3.bf16.msra.mxu1 %v7805_v11 }
 0x66b   :  { %6216 = vmatprep.subr.bf16.mxu1 %v7767_v61 }
 0x66e   :  { %6218 = vmatpush3.bf16.msra.mxu1 %v7806_v32 }
 0x66f   :  { %6219 = vmatprep.subr.bf16.mxu1 %v7767_v61 }
 0x671   :  { %5348 = vmatmul.mubr.f32.vlgmr.msra.gmra.mrb[6].mxu1 %v7466_v35 }
 0x672   :  { %6221 = vmatpush3.bf16.msra.mxu1 %v6519_v14  ;;  %5382 = vmatprep.mubr.msk.f32.mxu1 %vm6463_vm0, %v7768_v9 }
 0x673   :  { %6222 = vmatprep.subr.bf16.mxu1 %v7767_v61 }
 0x676   :  { %6224 = vmatpush3.bf16.msra.mxu1 %v6533_v20 }
 0x677   :  { %6225 = vmatprep.subr.bf16.mxu1 %v7767_v61 }
 0x67a   :  { %6227 = vmatpush3.bf16.msra.mxu1 %v6581_v46 }
 0x67b   :  { %6228 = vmatprep.subr.bf16.mxu1 %v7767_v61 }
 0x67e   :  { %6230 = vmatpush3.bf16.msra.mxu1 %v6611_v63 }
 0x67f   :  { %6231 = vmatprep.subr.bf16.mxu1 %v7767_v61 }
 0x682   :  { %6233 = vmatpush3.bf16.msra.mxu1 %v6650_v39 }
 0x683   :  { %6234 = vmatprep.subr.bf16.mxu1 %v7767_v61 }
 0x686   :  { %6236 = vmatpush3.bf16.msra.mxu1 %v6671_v1 }
 0x687   :  { %6237 = vmatprep.subr.bf16.mxu1 %v7767_v61 }
 0x68a   :  { %6239 = vmatpush3.bf16.msra.mxu1 %v6675_v13 }
 0x68b   :  { %6240 = vmatprep.subr.bf16.mxu1 %v7767_v61 }
 0x68e   :  { %6242 = vmatpush3.bf16.msra.mxu1 %v6730_v5 }
 0x691   :  { %5383 = vmatmul.mubr.f32.vlgmr.msra.gmra.mrb[6].mxu1 %v7466_v35 }
 0x764   :  { %v3194_v36 = vpop.f32.mrb[6].mxu1 }
 0x765   :  { %v7563_v3 = vsub.f32 %v7463_v28, %v3194_v36  ;;  %v5384_v30 = vpop.f32.mrb[7].mxu1 }
 0x767   :  { %v3199_v33 = vmul.f32 %v7563_v3, %v7563_v3 }
 0x769   :  { %v7567_v44 = vand.u32 4294901760, %v3199_v33 }
 0x76b   :  { %v3282_v31 = vsub.f32 %v3199_v33, %v7567_v44 }
 0x76d   :  { %v3283_v0 = vand.u32 4294901760, %v3282_v31 }
 0x76f   :  { %v3284_v21 = vsub.f32 %v3282_v31, %v3283_v0 }
 0x771   :  { %v3285_v51 = vand.u32 4294901760, %v3284_v21 }
 0x773   :  { %5418 = vmatmul.mubr.f32.vlgmr.msra.gmra.mrb[4].mxu0 %v3285_v51 }
 0x774   :  { %6269 = vmatpush3.bf16.msra.mxu0 %v6587_v49  ;;  %5452 = vmatprep.mubr.msk.f32.mxu0 %vm6463_vm0, %v7768_v9 }
 0x775   :  { %6270 = vmatprep.subr.bf16.mxu0 %v7767_v61 }
 0x778   :  { %6272 = vmatpush3.bf16.msra.mxu0 %v6604_v60  ;;  %v3865_v60 = vld [vmem:[%s7678_s4 + $0x4] ss:$0 sm:$0xff] }
 0x779   :  { %6273 = vmatprep.subr.bf16.mxu0 %v7767_v61 }
 0x77c   :  { %6275 = vmatpush3.bf16.msra.mxu0 %v7785_v17 }
 0x77d   :  { %6276 = vmatprep.subr.bf16.mxu0 %v7767_v61 }
 0x780   :  { %6278 = vmatpush3.bf16.msra.mxu0 %v7786_v12 }
 0x781   :  { %6279 = vmatprep.subr.bf16.mxu0 %v7767_v61 }
 0x784   :  { %6281 = vmatpush3.bf16.msra.mxu0 %v7787_v10 }
 0x785   :  { %6282 = vmatprep.subr.bf16.mxu0 %v7767_v61 }
 0x788   :  { %6284 = vmatpush3.bf16.msra.mxu0 %v7788_v18 }
 0x789   :  { %6285 = vmatprep.subr.bf16.mxu0 %v7767_v61 }
 0x78c   :  { %6287 = vmatpush3.bf16.msra.mxu0 %v7789_v54 }
 0x78d   :  { %6288 = vmatprep.subr.bf16.mxu0 %v7767_v61 }
 0x790   :  { %6290 = vmatpush3.bf16.msra.mxu0 %v7790_v55 }
 0x791   :  { %6291 = vmatprep.subr.bf16.mxu0 %v7767_v61 }
 0x793   :  { %5453 = vmatmul.mubr.f32.vlgmr.msra.gmra.mrb[4].mxu0 %v7567_v44 }
 0x794   :  { %6293 = vmatpush3.bf16.msra.mxu0 %v7791_v4  ;;  %5487 = vmatprep.mubr.msk.f32.mxu0 %vm6463_vm0, %v7768_v9 }
 0x795   :  { %6294 = vmatprep.subr.bf16.mxu0 %v7767_v61 }
 0x798   :  { %6296 = vmatpush3.bf16.msra.mxu0 %v7792_v8 }
 0x799   :  { %6297 = vmatprep.subr.bf16.mxu0 %v7767_v61 }
 0x79c   :  { %6299 = vmatpush3.bf16.msra.mxu0 %v7793_v6 }
 0x79d   :  { %6300 = vmatprep.subr.bf16.mxu0 %v7767_v61 }
 0x7a0   :  { %6302 = vmatpush3.bf16.msra.mxu0 %v7794_v29 }
 0x7a1   :  { %6303 = vmatprep.subr.bf16.mxu0 %v7767_v61 }
 0x7a4   :  { %6305 = vmatpush3.bf16.msra.mxu0 %v7795_v2 }
 0x7a5   :  { %6306 = vmatprep.subr.bf16.mxu0 %v7767_v61 }
 0x7a8   :  { %6308 = vmatpush3.bf16.msra.mxu0 %v7796_v48 }
 0x7a9   :  { %6309 = vmatprep.subr.bf16.mxu0 %v7767_v61 }
 0x7ac   :  { %6311 = vmatpush3.bf16.msra.mxu0 %v7797_v25 }
 0x7ad   :  { %6312 = vmatprep.subr.bf16.mxu0 %v7767_v61 }
 0x7b0   :  { %6314 = vmatpush3.bf16.msra.mxu0 %v7798_v27 }
 0x7b1   :  { %6315 = vmatprep.subr.bf16.mxu0 %v7767_v61 }
 0x7b3   :  { %5488 = vmatmul.mubr.f32.vlgmr.msra.gmra.mrb[4].mxu0 %v3282_v31 }
 0x7b4   :  { %6317 = vmatpush3.bf16.msra.mxu0 %v6519_v14  ;;  %5522 = vmatprep.mubr.msk.f32.mxu0 %vm6463_vm0, %v7768_v9 }
 0x7b5   :  { %6318 = vmatprep.subr.bf16.mxu0 %v7767_v61 }
 0x7b8   :  { %6320 = vmatpush3.bf16.msra.mxu0 %v6533_v20 }
 0x7b9   :  { %6321 = vmatprep.subr.bf16.mxu0 %v7767_v61 }
 0x7bc   :  { %6323 = vmatpush3.bf16.msra.mxu0 %v6581_v46 }
 0x7bd   :  { %6324 = vmatprep.subr.bf16.mxu0 %v7767_v61 }
 0x7c0   :  { %6326 = vmatpush3.bf16.msra.mxu0 %v6611_v63 }
 0x7c1   :  { %6327 = vmatprep.subr.bf16.mxu0 %v7767_v61 }
 0x7c4   :  { %6329 = vmatpush3.bf16.msra.mxu0 %v6650_v39 }
 0x7c5   :  { %6330 = vmatprep.subr.bf16.mxu0 %v7767_v61 }
 0x7c8   :  { %6332 = vmatpush3.bf16.msra.mxu0 %v6671_v1 }
 0x7c9   :  { %6333 = vmatprep.subr.bf16.mxu0 %v7767_v61 }
 0x7cc   :  { %6335 = vmatpush3.bf16.msra.mxu0 %v6675_v13 }
 0x7cd   :  { %6336 = vmatprep.subr.bf16.mxu0 %v7767_v61 }
 0x7d0   :  { %6338 = vmatpush3.bf16.msra.mxu0 %v6730_v5 }
 0x7d1   :  { %6339 = vmatprep.subr.bf16.mxu0 %v7767_v61 }
 0x7d3   :  { %5523 = vmatmul.mubr.f32.vlgmr.msra.gmra.mrb[4].mxu0 %v3283_v0 }
 0x7d4   :  { %6341 = vmatpush3.bf16.msra.mxu0 %v7799_v24  ;;  %5557 = vmatprep.mubr.msk.f32.mxu0 %vm6463_vm0, %v7768_v9 }
 0x7d5   :  { %6342 = vmatprep.subr.bf16.mxu0 %v7767_v61 }
 0x7d8   :  { %6344 = vmatpush3.bf16.msra.mxu0 %v7800_v59 }
 0x7d9   :  { %6345 = vmatprep.subr.bf16.mxu0 %v7767_v61 }
 0x7dc   :  { %6347 = vmatpush3.bf16.msra.mxu0 %v7801_v58 }
 0x7dd   :  { %6348 = vmatprep.subr.bf16.mxu0 %v7767_v61 }
 0x7e0   :  { %6350 = vmatpush3.bf16.msra.mxu0 %v7802_v47 }
 0x7e1   :  { %6351 = vmatprep.subr.bf16.mxu0 %v7767_v61 }
 0x7e4   :  { %6353 = vmatpush3.bf16.msra.mxu0 %v7803_v38 }
 0x7e5   :  { %6354 = vmatprep.subr.bf16.mxu0 %v7767_v61 }
 0x7e8   :  { %6356 = vmatpush3.bf16.msra.mxu0 %v7804_v45 }
 0x7e9   :  { %6357 = vmatprep.subr.bf16.mxu0 %v7767_v61 }
 0x7ec   :  { %6359 = vmatpush3.bf16.msra.mxu0 %v7805_v11 }
 0x7ed   :  { %6360 = vmatprep.subr.bf16.mxu0 %v7767_v61 }
 0x7f0   :  { %6362 = vmatpush3.bf16.msra.mxu0 %v7806_v32 }
 0x7f1   :  { %6363 = vmatprep.subr.bf16.mxu0 %v7767_v61 }
 0x7f3   :  { %5558 = vmatmul.mubr.f32.vlgmr.msra.gmra.mrb[4].mxu0 %v7567_v44 }
 0x7f4   :  { %6365 = vmatpush3.bf16.msra.mxu0 %v6519_v14  ;;  %5592 = vmatprep.mubr.msk.f32.mxu0 %vm6463_vm0, %v7768_v9  ;;  %v3866_v9 = vld [vmem:[%s7678_s4 + $0x5] ss:$0 sm:$0xff] }
 0x7f5   :  { %6366 = vmatprep.subr.bf16.mxu0 %v7767_v61 }
 0x7f8   :  { %6368 = vmatpush3.bf16.msra.mxu0 %v6533_v20 }
 0x7f9   :  { %6369 = vmatprep.subr.bf16.mxu0 %v7767_v61 }
 0x7fc   :  { %6371 = vmatpush3.bf16.msra.mxu0 %v6581_v46 }
 0x7fd   :  { %6372 = vmatprep.subr.bf16.mxu0 %v7767_v61 }
 0x800   :  { %6374 = vmatpush3.bf16.msra.mxu0 %v6611_v63 }
 0x801   :  { %6375 = vmatprep.subr.bf16.mxu0 %v7767_v61 }
 0x804   :  { %6377 = vmatpush3.bf16.msra.mxu0 %v6650_v39 }
 0x805   :  { %6378 = vmatprep.subr.bf16.mxu0 %v7767_v61 }
 0x808   :  { %6380 = vmatpush3.bf16.msra.mxu0 %v6671_v1 }
 0x809   :  { %6381 = vmatprep.subr.bf16.mxu0 %v7767_v61 }
 0x80c   :  { %6383 = vmatpush3.bf16.msra.mxu0 %v6675_v13  ;;  %v6461_v13 = vld [vmem:[%s7676_s0] sm:$0xf] }
 0x80d   :  { %6384 = vmatprep.subr.bf16.mxu0 %v7767_v61 }
 0x810   :  { %6386 = vmatpush3.bf16.msra.mxu0 %v6730_v5 }
 0x813   :  { %5593 = vmatmul.mubr.f32.vlgmr.msra.gmra.mrb[4].mxu0 %v7567_v44 }
 0x8e6   :  { %v3837_v14 = vpop.f32.mrb[4].mxu0 }
 0x8e7   :  { %v6391_v20 = vadd.f32 1e-05, %v3837_v14  ;;  %v5594_v46 = vpop.f32.mrb[5].mxu0 }
 0x8e9   :  { %6459 = vrsqrt.f32 %v6391_v20 }
 0x8f3   :  { %v6460_v49 = vpop.eup %6459 }
 0x8f4   :  { %v3842_v63 = vmul.f32 %v6460_v49, %v7563_v3 }
 0x8f6   :  { %v3848_v39 = vmul.f32 %v3865_v60, %v3842_v63 }
 0x8f8   :  { %v3854_v1 = vadd.f32 %v3866_v9, %v3848_v39 }
 0x8fa   :  { %v3855_v5 = vadd.f32 %v6461_v13, %v3854_v1 }
 0x8fc   :  { %3856 = vst [vmem:[%s7680_s5] sm:$0xf] %v3855_v5 }

</bundles_post_ra>
